<compile_context>
chip_gen: v7x
topology: tpu7x:2x2x1
jax: 0.10.0
libtpu: 0.0.40
codegen_flags: <defaults>
</compile_context>

<pallas_src>
import jax
import jax.numpy as jnp
import numpy as np
from jax.experimental import pallas as pl
from jax.experimental.pallas import tpu as pltpu


def tsn_kernel(p_ref, ones_ref, cw_ref, cb_ref, fw_ref, fb_ref, out_ref):
    """One grid step = one batch element n (all T segments fused).

    p_ref    : (1, THW, 9C) bf16  im2col patches for batch n, rows ordered (t, h, w)
    ones_ref : (1, THW)     f32   all-ones pooling row (1/THW folded into fw)
    cw_ref   : (9C, F)      bf16  conv weights, tap-major rows, F zero-padded to 128
    cb_ref   : (1, F)       f32   conv bias (zero in padded columns)
    fw_ref   : (F, NC)      f32   head FC weight / (T*H*W), zero in padded rows
    fb_ref   : (1, NC)      f32   head FC bias
    out_ref  : (1, 1, NC)   f32   consensus logits for batch n
    """
    # Backbone: 3x3 conv (pad=1) as ONE im2col MXU matmul, f32 accumulation.
    feat = jnp.dot(p_ref[0], cw_ref[...],
                   preferred_element_type=jnp.float32)            # (THW, F)
    feat = jnp.maximum(feat + cb_ref[...], 0.0)                   # bias + ReLU, f32

    # Head GAP + consensus: sum over all T*H*W rows as an MXU dot (== mean over T of
    # per-frame GAP, since every segment pools the same H*W count). 1/THW lives in fw.
    pooled = jnp.dot(ones_ref[...], feat,
                     preferred_element_type=jnp.float32)          # (1, F)

    # Head FC applied once per batch element (folded through the linear consensus).
    logits = jnp.dot(pooled, fw_ref[...],
                     preferred_element_type=jnp.float32) + fb_ref[...]   # (1, NC)
    out_ref[0] = logits.astype(out_ref.dtype)


def tsn_forward(imgs, conv_w, conv_b, fc_w, fc_b, *, feat_pad=128):
    """imgs: (N, C, T, H, W) f32, conv_w: (3, 3, C, F). Returns {'probs': (N, NC)}."""
    N, C, T, H, W = imgs.shape
    F = conv_w.shape[-1]
    NC = fc_w.shape[-1]
    THW = T * H * W
    KC = 9 * C
    FP = max(feat_pad, F)

    # Host-side im2col, tap-major then c: (N, THW, 9C) bf16. The 36-wide minor dim is
    # already tile-padded to 128 lanes in HBM, so this costs no extra bytes vs 9x taps.
    # TODO(synk): at realistic shapes fold this relayout into the producer / index_map.
    x = jnp.transpose(imgs, (0, 2, 3, 4, 1))                      # (N, T, H, W, C)
    x_pad = jnp.pad(x, ((0, 0), (0, 0), (1, 1), (1, 1), (0, 0)))
    patches = jnp.concatenate(
        [x_pad[:, :, dy:dy + H, dx:dx + W, :] for dy in range(3) for dx in range(3)],
        axis=-1)                                                  # (N, T, H, W, 9C)
    patches = patches.reshape(N, THW, KC).astype(jnp.bfloat16)

    # Weights: conv output padded to FP=128 lanes (zero columns exact under ReLU and
    # zero FC rows); pooling scale 1/THW folded into the FC weight.
    cw = jnp.pad(conv_w.reshape(KC, F), ((0, 0), (0, FP - F))).astype(jnp.bfloat16)
    cb = jnp.pad(conv_b, (0, FP - F)).reshape(1, FP).astype(jnp.float32)
    fw = jnp.pad(fc_w / THW, ((0, FP - F), (0, 0))).astype(jnp.float32)
    fb = fc_b.reshape(1, NC).astype(jnp.float32)
    ones_row = jnp.ones((1, THW), jnp.float32)                    # built once, host-side

    out = pl.pallas_call(
        tsn_kernel,
        out_shape=jax.ShapeDtypeStruct((N, 1, NC), jnp.float32),
        grid=(N,),
        in_specs=[
            pl.BlockSpec((1, THW, KC), lambda n: (n, 0, 0)),
            pl.BlockSpec((1, THW), lambda n: (0, 0)),
            pl.BlockSpec((KC, FP), lambda n: (0, 0)),
            pl.BlockSpec((1, FP), lambda n: (0, 0)),
            pl.BlockSpec((FP, NC), lambda n: (0, 0)),
            pl.BlockSpec((1, NC), lambda n: (0, 0)),
        ],
        out_specs=pl.BlockSpec((1, 1, NC), lambda n: (n, 0, 0)),
        compiler_params=pltpu.CompilerParams(
            dimension_semantics=("parallel",)),
    )(patches, ones_row, cw, cb, fw, fb)

    return {"probs": out.reshape(N, NC)}


def tsn_reference(imgs, conv_w, conv_b, fc_w, fc_b):
    """Pure-JAX f32 reference (module semantics) for the correctness check."""
    N, C, T, H, W = imgs.shape
    F = conv_w.shape[-1]
    x = jnp.transpose(imgs, (0, 2, 3, 4, 1))                      # (N, T, H, W, C)
    x_pad = jnp.pad(x, ((0, 0), (0, 0), (1, 1), (1, 1), (0, 0)))
    patches = jnp.stack(
        [x_pad[:, :, dy:dy + H, dx:dx + W, :] for dy in range(3) for dx in range(3)],
        axis=-2,
    ).reshape(N, T, H * W, 9 * C)
    w2 = conv_w.reshape(9 * C, F)                                 # (dy, dx) major, c minor
    feat = jnp.maximum(patches @ w2 + conv_b, 0.0)                # (N, T, HW, F)
    pooled = feat.mean(axis=2)                                    # (N, T, F)   head GAP
    logits = pooled @ fc_w + fc_b                                 # (N, T, NC)  head FC
    return logits.mean(axis=1)                                    # (N, NC)     consensus


if __name__ == "__main__":
    # Small, module-consistent shapes: batch=2, channels=4, T=8 segments, 16x16 frames.
    N, C, T, H, W = 2, 4, 8, 16, 16
    FEAT, NUM_CLASSES = 32, 16

    key = jax.random.PRNGKey(0)
    k_img, k_cw, k_cb, k_fw, k_fb = jax.random.split(key, 5)

    imgs = jax.random.normal(k_img, (N, C, T, H, W), dtype=jnp.float32)
    conv_w = jax.random.normal(k_cw, (3, 3, C, FEAT), dtype=jnp.float32) * 0.1
    conv_b = jax.random.normal(k_cb, (FEAT,), dtype=jnp.float32) * 0.1
    fc_w = jax.random.normal(k_fw, (FEAT, NUM_CLASSES), dtype=jnp.float32) * 0.1
    fc_b = jax.random.normal(k_fb, (NUM_CLASSES,), dtype=jnp.float32) * 0.1

    out = tsn_forward(imgs, conv_w, conv_b, fc_w, fc_b)
    probs = jax.block_until_ready(out["probs"])

    ref = jax.block_until_ready(tsn_reference(imgs, conv_w, conv_b, fc_w, fc_b))
    # bf16 quantization of patches/conv weights vs the f32 reference -> loosened tol.
    np.testing.assert_allclose(np.asarray(probs), np.asarray(ref),
                               rtol=2e-2, atol=2e-2)
    print("KERNEL_OK")
</pallas_src>

<mosaic_0001>
module attributes {stable_mosaic.version = 11 : i64} {
  func.func @tsn_kernel(%arg0: i32, %arg1: memref<1x2048x36xbf16, #tpu.memory_space<vmem>>, %arg2: memref<1x2048xf32, #tpu.memory_space<vmem>>, %arg3: memref<36x128xbf16, #tpu.memory_space<vmem>>, %arg4: memref<1x128xf32, #tpu.memory_space<vmem>>, %arg5: memref<128x16xf32, #tpu.memory_space<vmem>>, %arg6: memref<1x16xf32, #tpu.memory_space<vmem>>, %arg7: memref<1x1x16xf32, #tpu.memory_space<vmem>>) attributes {dimension_semantics = [#tpu.dimension_semantics<parallel>], iteration_bounds = array<i64: 2>, scalar_prefetch = 0 : i64, scratch_operands = 0 : i64, tpu.core_type = #tpu.core_type<tc>, window_params = [{transform_indices = @transform_0, window_bounds = array<i64: 1, 2048, 36>}, {pipeline_mode = #tpu.pipeline_mode<synchronous>, transform_indices = @transform_1, window_bounds = array<i64: 1, 2048>}, {pipeline_mode = #tpu.pipeline_mode<synchronous>, transform_indices = @transform_2, window_bounds = array<i64: 36, 128>}, {pipeline_mode = #tpu.pipeline_mode<synchronous>, transform_indices = @transform_3, window_bounds = array<i64: 1, 128>}, {pipeline_mode = #tpu.pipeline_mode<synchronous>, transform_indices = @transform_4, window_bounds = array<i64: 128, 16>}, {pipeline_mode = #tpu.pipeline_mode<synchronous>, transform_indices = @transform_5, window_bounds = array<i64: 1, 16>}, {transform_indices = @transform_6, window_bounds = array<i64: 1, 1, 16>}]} {
    %c0 = arith.constant 0 : index
    %c0_0 = arith.constant 0 : index
    %c0_1 = arith.constant 0 : index
    %0 = vector.load %arg1[%c0, %c0_0, %c0_1] : memref<1x2048x36xbf16, #tpu.memory_space<vmem>>, vector<1x2048x36xbf16>
    %1 = vector.shape_cast %0 : vector<1x2048x36xbf16> to vector<2048x36xbf16>
    %c0_2 = arith.constant 0 : index
    %c0_3 = arith.constant 0 : index
    %2 = vector.load %arg3[%c0_2, %c0_3] : memref<36x128xbf16, #tpu.memory_space<vmem>>, vector<36x128xbf16>
    %cst = arith.constant dense<0.000000e+00> : vector<2048x128xf32>
    %3 = tpu.matmul %1, %2, %cst {dimension_numbers = #tpu.dot_dimension_numbers<[1], [0], [0], [1], [0, 0, 1, 1], [], []>} : vector<2048x36xbf16>, vector<36x128xbf16>, vector<2048x128xf32> -> vector<2048x128xf32>
    %c0_4 = arith.constant 0 : index
    %c0_5 = arith.constant 0 : index
    %4 = vector.load %arg4[%c0_4, %c0_5] : memref<1x128xf32, #tpu.memory_space<vmem>>, vector<1x128xf32>
    %5 = vector.broadcast %4 : vector<1x128xf32> to vector<2048x128xf32>
    %6 = arith.addf %3, %5 : vector<2048x128xf32>
    %cst_6 = arith.constant 0.000000e+00 : f32
    %7 = vector.broadcast %cst_6 : f32 to vector<2048x128xf32>
    %8 = arith.maximumf %6, %7 : vector<2048x128xf32>
    %c0_7 = arith.constant 0 : index
    %c0_8 = arith.constant 0 : index
    %9 = vector.load %arg2[%c0_7, %c0_8] : memref<1x2048xf32, #tpu.memory_space<vmem>>, vector<1x2048xf32>
    %cst_9 = arith.constant dense<0.000000e+00> : vector<1x128xf32>
    %10 = tpu.matmul %9, %8, %cst_9 {dimension_numbers = #tpu.dot_dimension_numbers<[1], [0], [0], [1], [0, 0, 1, 1], [], []>} : vector<1x2048xf32>, vector<2048x128xf32>, vector<1x128xf32> -> vector<1x128xf32>
    %c0_10 = arith.constant 0 : index
    %c0_11 = arith.constant 0 : index
    %11 = vector.load %arg5[%c0_10, %c0_11] : memref<128x16xf32, #tpu.memory_space<vmem>>, vector<128x16xf32>
    %cst_12 = arith.constant dense<0.000000e+00> : vector<1x16xf32>
    %12 = tpu.matmul %10, %11, %cst_12 {dimension_numbers = #tpu.dot_dimension_numbers<[1], [0], [0], [1], [0, 0, 1, 1], [], []>} : vector<1x128xf32>, vector<128x16xf32>, vector<1x16xf32> -> vector<1x16xf32>
    %c0_13 = arith.constant 0 : index
    %c0_14 = arith.constant 0 : index
    %13 = vector.load %arg6[%c0_13, %c0_14] : memref<1x16xf32, #tpu.memory_space<vmem>>, vector<1x16xf32>
    %14 = arith.addf %12, %13 : vector<1x16xf32>
    %c0_15 = arith.constant 0 : index
    %c0_16 = arith.constant 0 : index
    %c0_17 = arith.constant 0 : index
    %15 = vector.load %arg7[%c0_15, %c0_16, %c0_17] : memref<1x1x16xf32, #tpu.memory_space<vmem>>, vector<1x1x16xf32>
    %16 = vector.shape_cast %15 : vector<1x1x16xf32> to vector<1x16xf32>
    %17 = vector.shape_cast %14 : vector<1x16xf32> to vector<1x1x16xf32>
    tpu.vector_store %arg7[%c0_15, %c0_16, %c0_17], %17 {strides = array<i32>} : memref<1x1x16xf32, #tpu.memory_space<vmem>>, vector<1x1x16xf32>,
    return
  }
  func.func @transform_0(%arg0: i32) -> (i32, i32, i32) {
    %c0_i32 = arith.constant 0 : i32
    %c0_i32_0 = arith.constant 0 : i32
    %c0_i32_1 = arith.constant 0 : i32
    return %arg0, %c0_i32, %c0_i32_0 : i32, i32, i32
  }
  func.func @transform_1(%arg0: i32) -> (i32, i32) {
    %c0_i32 = arith.constant 0 : i32
    %c0_i32_0 = arith.constant 0 : i32
    %c0_i32_1 = arith.constant 0 : i32
    return %c0_i32, %c0_i32_0 : i32, i32
  }
  func.func @transform_2(%arg0: i32) -> (i32, i32) {
    %c0_i32 = arith.constant 0 : i32
    %c0_i32_0 = arith.constant 0 : i32
    %c0_i32_1 = arith.constant 0 : i32
    return %c0_i32, %c0_i32_0 : i32, i32
  }
  func.func @transform_3(%arg0: i32) -> (i32, i32) {
    %c0_i32 = arith.constant 0 : i32
    %c0_i32_0 = arith.constant 0 : i32
    %c0_i32_1 = arith.constant 0 : i32
    return %c0_i32, %c0_i32_0 : i32, i32
  }
  func.func @transform_4(%arg0: i32) -> (i32, i32) {
    %c0_i32 = arith.constant 0 : i32
    %c0_i32_0 = arith.constant 0 : i32
    %c0_i32_1 = arith.constant 0 : i32
    return %c0_i32, %c0_i32_0 : i32, i32
  }
  func.func @transform_5(%arg0: i32) -> (i32, i32) {
    %c0_i32 = arith.constant 0 : i32
    %c0_i32_0 = arith.constant 0 : i32
    %c0_i32_1 = arith.constant 0 : i32
    return %c0_i32, %c0_i32_0 : i32, i32
  }
  func.func @transform_6(%arg0: i32) -> (i32, i32, i32) {
    %c0_i32 = arith.constant 0 : i32
    %c0_i32_0 = arith.constant 0 : i32
    %c0_i32_1 = arith.constant 0 : i32
    return %arg0, %c0_i32, %c0_i32_0 : i32, i32, i32
  }
}

</mosaic_0001>

<bundles_post_ra>
// kernel: tpu_custom_call.1
= control target key start
LH: loop header
LB: loop body
LE: loop exit
PB: predicated region body
PF: predicated region fallthrough
CT: control target
= control target key end

     0   :  { %11 = vsyncpa [#allocation3], 0  ;;  %s6240_s0 = inlined_call_operand.vmem [shape: bf16[2,2048,36], index: 0, kind: input, shape index: {}]   ;;  %s6241_s1 = inlined_call_operand.vmem [shape: f32[1,2048], index: 1, kind: input, shape index: {}]   ;;  %s6242_s2 = inlined_call_operand.vmem [shape: bf16[36,128], index: 2, kind: input, shape index: {}]   ;;  %s6243_s3 = inlined_call_operand.vmem [shape: f32[1,128], index: 3, kind: input, shape index: {}]   ;;  %s6244_s4 = inlined_call_operand.vmem [shape: f32[128,16], index: 4, kind: input, shape index: {}]   ;;  %s6245_s5 = inlined_call_operand.vmem [shape: f32[1,16], index: 5, kind: input, shape index: {}]   ;;  %s6246_s6 = inlined_call_operand.hbm [shape: f32[2,1,16], index: 6, kind: output, shape index: {}]  }
   0x1   :  { %13 = vsyncpa [#allocation3 + $0x1], 0  ;;  %s5238_s21 = smov 0   ;;  %s5240_s22 = smov 0  }
   0x2   :  { %s5242_s23 = smov 0   ;;  %s5244_s24 = smov 0  }
   0x3 LB: > { %s5259_s25 = sadd.s32 4294967295, %s5197_s24   ;;  %s3676_s26 = sadd.s32 4294967294, %s5197_s24   ;;  %s5197_s24 = sphi %s5244_s24, %s6256_s24   ;;  %s5193_s23 = sphi %s5242_s23, %s6255_s23   ;;  %s5189_s22 = sphi %s5240_s22, %s6254_s22   ;;  %s5185_s21 = sphi %s5238_s21, %s6253_s21  }
   0x4   : > { %s5263_s27 = sadd.s32 1, %s5197_s24   ;;  %s157_s28 = sadd.s32 1, %s5193_s23 }
   0x5   : > { %s154_s29 = ssub.s32 %s5197_s24, %s5263_s27  ;;  %p167_p0 = scmp.ne.s32.totalorder %s5193_s23, %s5189_s22 }
   0x6   : > { %p155_p1 = scmp.eq.s32.totalorder %s154_s29, 0  ;;  %p168_p2 = scmp.eq.s32.totalorder %s5259_s25, 1 }
   0x7   : > { %p173_p3 = scmp.ne.s32.totalorder %s5189_s22, %s5185_s21  ;;  %p174_p4 = scmp.eq.s32.totalorder %s3676_s26, 1 }
   0x8   : > { %s5274_s30 = scalar_select %p155_p1, %s5193_s23, %s157_s28  }
   0x9   : > { %p5276_p5 = por %p168_p2, %p167_p0  ;;  %p5280_p6 = por %p174_p4, %p173_p3 }
   0xa   : > { %p3679_p7 = scmp.ge.s32.totalorder %s5197_s24, 1  ;;  %p215_p8 = scmp.lt.s32.totalorder %s5197_s24, 3 }
   0xc   : > { %p216_p9 = pnand %p3679_p7, %p215_p8 }
   0xd   : > { %v5001_v0 = vld [vmem:[%s6242_s2] sm:$0xff] (!%p216_p9)   ;;  %v5002_v1 = vld [vmem:[%s6242_s2 + $0x8] sm:$0xff] (!%p216_p9)   ;;  %p244_p10 = scmp.lt.s32.totalorder (!%p216_p9), %s5259_s25, 1  ;;  %v5003_v2 = vld [vmem:[%s6242_s2 + $0x10] ss:$0 sps:$4 sm:$0x33] (!%p216_p9)  }
   0xe   : > { %219 = sbr.rel (%p216_p9) target bundleno = 1141 (0x475), region = 44  ;;  %4374 = vmatprep.subr.bf16.mxu0 (!%p216_p9), %v5001_v0  ;;  %4951 = vmatprep.subr.bf16.mxu1 (!%p216_p9), %v5001_v0  ;;  %vm1558_vm0 = vcmask (!%p216_p9), 1041408   ;;  %vm1173_vm1 = vcmask (!%p216_p9), 293888   ;;  %vm5200_vm2 = vmmov (!%p216_p9), 0   ;;  %s3942_s28 = sshll.u32 (!%p216_p9), %s5259_s25, 4  ;;  %vm3606_vm3 = vcmask (!%p216_p9), 122880  }
   0xf   : > { %4375 = vmatpush3.bf16.msra.mxu0 (!%p216_p9), %v5001_v0  ;;  %4954 = vmatpush3.bf16.msra.mxu1 (!%p216_p9), %v5001_v0  ;;  %v1560_v4 = vsel (!%p216_p9), %vm1558_vm0, %v5003_v2, 0  ;;  %s6198_s12 = scalar_lea.hbm (!%p216_p9), %s6246_s6, %s3942_s28 }
  0x10   : > { %4376 = vmatprep.subr.bf16.mxu0 (!%p216_p9), %v5002_v1  ;;  %4952 = vmatprep.subr.bf16.mxu1 (!%p216_p9), %v5002_v1 }
  0x13   : > { %4377 = vmatpush3.bf16.msra.mxu0 (!%p216_p9), %v5002_v1  ;;  %4955 = vmatpush3.bf16.msra.mxu1 (!%p216_p9), %v5002_v1 }
  0x14   : > { %4957 = vmatprep.subr.msk.bf16.mxu0 (!%p216_p9), %vm1558_vm0, %v5003_v2  ;;  %4958 = vmatprep.subr.msk.bf16.mxu1 (!%p216_p9), %vm1558_vm0, %v5003_v2 }
  0x15   : > { %s245_s13 = scalar_select %p244_p10, %s5259_s25, 1 }
  0x16   : > { %s5202_s25 = smov [#allocation2]  }
  0x17   : > { %s3945_s16 = sshll.u32 %s245_s13, 10  ;;  %4379 = vmatpush3.bf16.msra.mxu0 %v1560_v4  ;;  %4956 = vmatpush3.bf16.msra.mxu1 %v1560_v4  ;;  %s5139_s15 = sshll.u32 %s5202_s25, 4  ;;  %s5140_s15 = int_to_ptr.vmem [resolvable:$false] %s5139_s15 }
  0x18   : > { %s5300_s19 = scalar_lea.vmem %s6240_s0, %s3945_s16  ;;  %s5141_s16 = scalar_lea.vmem %s5140_s15, 32 }
  0x19   : > { %v5004_v3 = vld [vmem:[%s5300_s19] sm:$0xff]   ;;  %v5005_v5 = vld [vmem:[%s5300_s19 + $0x8] sm:$0xff]   ;;  %v5006_v6 = vld [vmem:[%s5300_s19 + $0x10] sm:$0xff]  }
  0x1a   : > { %4380 = vmatprep.mubr.msk.bf16.mxu0 %vm1173_vm1, %v5004_v3  ;;  %v5007_v7 = vld [vmem:[%s5300_s19 + $0x18] sm:$0xff]   ;;  %v5008_v8 = vld [vmem:[%s5300_s19 + $0x20] sm:$0xff]   ;;  %v5009_v9 = vld [vmem:[%s5300_s19 + $0x28] sm:$0xff]  }
  0x1b   : > { %4381 = vmatmul.mubr.msk.bf16.vlgmr.msra.gmra.mrb[0].mxu0 %vm1173_vm1, %v5005_v5  ;;  %v5010_v10 = vld [vmem:[%s5300_s19 + $0x30] sm:$0xff]   ;;  %v5011_v11 = vld [vmem:[%s5300_s19 + $0x38] sm:$0xff]   ;;  %v5012_v12 = vld [vmem:[%s5300_s19 + $0x40] sm:$0xff]  }
  0x1c   : > { %4384 = vmatprep.mubr.msk.bf16.mxu0 %vm1173_vm1, %v5006_v6  ;;  %v5013_v13 = vld [vmem:[%s5300_s19 + $0x48] sm:$0xff]   ;;  %v5014_v14 = vld [vmem:[%s5300_s19 + $0x50] sm:$0xff]   ;;  %v5015_v15 = vld [vmem:[%s5300_s19 + $0x58] sm:$0xff]  }
  0x1d   : > { %v5016_v16 = vld [vmem:[%s5300_s19 + $0x60] sm:$0xff]   ;;  %v5017_v17 = vld [vmem:[%s5300_s19 + $0x68] sm:$0xff]   ;;  %v5018_v18 = vld [vmem:[%s5300_s19 + $0x70] sm:$0xff]  }
  0x1e   : > { %v5019_v19 = vld [vmem:[%s5300_s19 + $0x78] sm:$0xff]   ;;  %v5020_v20 = vld [vmem:[%s5300_s19 + $0x80] sm:$0xff]   ;;  %v5021_v21 = vld [vmem:[%s5300_s19 + $0x88] sm:$0xff]  }
  0x1f   : > { %v5022_v22 = vld [vmem:[%s5300_s19 + $0x90] sm:$0xff]   ;;  %v5055_v24 = vld [vmem:[%s5300_s19 + $0x318] sm:$0xff]   ;;  %v5024_v26 = vld [vmem:[%s5300_s19 + $0xa0] sm:$0xff]  }
  0x20   : > { %v5054_v23 = vld [vmem:[%s5300_s19 + $0x310] sm:$0xff]   ;;  %v5023_v25 = vld [vmem:[%s5300_s19 + $0x98] sm:$0xff]   ;;  %v5058_v27 = vld [vmem:[%s5300_s19 + $0x320] sm:$0xff]  }
  0x21   : > { %4576 = vmatprep.mubr.msk.bf16.mxu1 %vm1173_vm1, %v5054_v23  ;;  %v5059_v28 = vld [vmem:[%s5300_s19 + $0x328] sm:$0xff]   ;;  %v5026_v30 = vld [vmem:[%s5300_s19 + $0xb0] sm:$0xff]   ;;  %v5027_v31 = vld [vmem:[%s5300_s19 + $0xb8] sm:$0xff]  }
  0x22   : > { %4577 = vmatmul.mubr.msk.bf16.vlgmr.msra.gmra.mrb[0].mxu1 %vm1173_vm1, %v5055_v24  ;;  %v5025_v29 = vld [vmem:[%s5300_s19 + $0xa8] sm:$0xff]   ;;  %v5062_v32 = vld [vmem:[%s5300_s19 + $0x330] sm:$0xff]   ;;  %v5063_v33 = vld [vmem:[%s5300_s19 + $0x338] sm:$0xff]  }
  0x23   : > { %4385 = vmatmul.mubr.msk.bf16.gmra.mrb[4].mxu0 %vm1173_vm1, %v5007_v7  ;;  %4580 = vmatprep.mubr.msk.bf16.mxu1 %vm1173_vm1, %v5058_v27  ;;  %v5028_v34 = vld [vmem:[%s5300_s19 + $0xc0] sm:$0xff]   ;;  %v5029_v35 = vld [vmem:[%s5300_s19 + $0xc8] sm:$0xff]   ;;  %v5030_v38 = vld [vmem:[%s5300_s19 + $0xd0] sm:$0xff]  }
  0x24   : > { %4388 = vmatprep.mubr.msk.bf16.mxu0 %vm1173_vm1, %v5008_v8  ;;  %v5066_v36 = vld [vmem:[%s5300_s19 + $0x340] sm:$0xff]   ;;  %v5067_v37 = vld [vmem:[%s5300_s19 + $0x348] sm:$0xff]   ;;  %v5031_v39 = vld [vmem:[%s5300_s19 + $0xd8] sm:$0xff]  }
  0x25   : > { %v5070_v40 = vld [vmem:[%s5300_s19 + $0x350] sm:$0xff]   ;;  %v5071_v41 = vld [vmem:[%s5300_s19 + $0x358] sm:$0xff]   ;;  %v5032_v42 = vld [vmem:[%s5300_s19 + $0xe0] sm:$0xff]  }
  0x26   : > { %v5074_v43 = vld [vmem:[%s5300_s19 + $0x360] sm:$0xff]   ;;  %v5033_v44 = vld [vmem:[%s5300_s19 + $0xe8] sm:$0xff]   ;;  %v5034_v46 = vld [vmem:[%s5300_s19 + $0xf0] sm:$0xff]  }
  0x27   : > { %v5075_v45 = vld [vmem:[%s5300_s19 + $0x368] sm:$0xff]   ;;  %v5078_v47 = vld [vmem:[%s5300_s19 + $0x370] sm:$0xff]   ;;  %v5035_v48 = vld [vmem:[%s5300_s19 + $0xf8] sm:$0xff]  }
  0x28   : > { %v5079_v49 = vld [vmem:[%s5300_s19 + $0x378] sm:$0xff]   ;;  %v5036_v50 = vld [vmem:[%s5300_s19 + $0x100] sm:$0xff]   ;;  %v5037_v52 = vld [vmem:[%s5300_s19 + $0x108] sm:$0xff]  }
  0x29   : > { %v5082_v51 = vld [vmem:[%s5300_s19 + $0x380] sm:$0xff]   ;;  %v5083_v53 = vld [vmem:[%s5300_s19 + $0x388] sm:$0xff]   ;;  %v5038_v54 = vld [vmem:[%s5300_s19 + $0x110] sm:$0xff]  }
  0x2a   : > { %4581 = vmatmul.mubr.msk.bf16.gmra.mrb[4].mxu1 %vm1173_vm1, %v5059_v28  ;;  %v5086_v55 = vld [vmem:[%s5300_s19 + $0x390] sm:$0xff]   ;;  %v5039_v56 = vld [vmem:[%s5300_s19 + $0x118] sm:$0xff]   ;;  %v5040_v58 = vld [vmem:[%s5300_s19 + $0x120] sm:$0xff]  }
  0x2b   : > { %4389 = vmatmul.mubr.msk.bf16.gmra.mrb[8].mxu0 %vm1173_vm1, %v5009_v9  ;;  %4584 = vmatprep.mubr.msk.bf16.mxu1 %vm1173_vm1, %v5062_v32  ;;  %v5087_v57 = vld [vmem:[%s5300_s19 + $0x398] sm:$0xff]   ;;  %v5090_v59 = vld [vmem:[%s5300_s19 + $0x3a0] sm:$0xff]   ;;  %v5041_v60 = vld [vmem:[%s5300_s19 + $0x128] sm:$0xff]  }
  0x2c   : > { %4392 = vmatprep.mubr.msk.bf16.mxu0 %vm1173_vm1, %v5010_v10  ;;  %v5091_v61 = vld [vmem:[%s5300_s19 + $0x3a8] sm:$0xff]   ;;  %v5042_v62 = vld [vmem:[%s5300_s19 + $0x130] sm:$0xff]   ;;  %v5043_v0 = vld [vmem:[%s5300_s19 + $0x138] sm:$0xff]  }
  0x2d   : > { %v5094_v63 = vld [vmem:[%s5300_s19 + $0x3b0] sm:$0xff]   ;;  %v5095_v1 = vld [vmem:[%s5300_s19 + $0x3b8] sm:$0xff]   ;;  %v5044_v2 = vld [vmem:[%s5300_s19 + $0x140] sm:$0xff]  }
  0x2e   : > { %v5098_v3 = vld [vmem:[%s5300_s19 + $0x3c0] sm:$0xff]   ;;  %v5045_v4 = vld [vmem:[%s5300_s19 + $0x148] sm:$0xff]   ;;  %v5046_v6 = vld [vmem:[%s5300_s19 + $0x150] sm:$0xff]  }
  0x2f   : > { %v5099_v5 = vld [vmem:[%s5300_s19 + $0x3c8] sm:$0xff]   ;;  %v5102_v7 = vld [vmem:[%s5300_s19 + $0x3d0] sm:$0xff]   ;;  %v5047_v8 = vld [vmem:[%s5300_s19 + $0x158] sm:$0xff]  }
  0x30   : > { %v5103_v9 = vld [vmem:[%s5300_s19 + $0x3d8] sm:$0xff]   ;;  %v5048_v10 = vld [vmem:[%s5300_s19 + $0x160] sm:$0xff]   ;;  %v5053_v24 = vld [vmem:[%s5300_s19 + $0x188] sm:$0xff]  }
  0x31   : > { %v5060_v27 = vld [vmem:[%s5300_s19 + $0x1a0] sm:$0xff]   ;;  %v5061_v28 = vld [vmem:[%s5300_s19 + $0x1a8] sm:$0xff]  }
  0x32   : > { %4585 = vmatmul.mubr.msk.bf16.gmra.mrb[8].mxu1 %vm1173_vm1, %v5063_v33 }
  0x33   : > { %4393 = vmatmul.mubr.msk.bf16.gmra.mrb[12].mxu0 %vm1173_vm1, %v5011_v11  ;;  %4588 = vmatprep.mubr.msk.bf16.mxu1 %vm1173_vm1, %v5066_v36  ;;  %v5106_v11 = vld [vmem:[%s5300_s19 + $0x3e0] sm:$0xff]  }
  0x34   : > { %4396 = vmatprep.mubr.msk.bf16.mxu0 %vm1173_vm1, %v5012_v12  ;;  %v5049_v12 = vld [vmem:[%s5300_s19 + $0x168] sm:$0xff]  }
  0x3a   : > { %4589 = vmatmul.mubr.msk.bf16.gmra.mrb[12].mxu1 %vm1173_vm1, %v5067_v37  ;;  %v5068_v37 = vld [vmem:[%s5300_s19 + $0x1c0] sm:$0xff]  }
  0x3b   : > { %4397 = vmatmul.mubr.msk.bf16.gmra.mrb[16].mxu0 %vm1173_vm1, %v5013_v13  ;;  %4592 = vmatprep.mubr.msk.bf16.mxu1 %vm1173_vm1, %v5070_v40  ;;  %v5107_v13 = vld [vmem:[%s5300_s19 + $0x3e8] sm:$0xff]  }
  0x3c   : > { %4400 = vmatprep.mubr.msk.bf16.mxu0 %vm1173_vm1, %v5014_v14  ;;  %v5050_v14 = vld [vmem:[%s5300_s19 + $0x170] sm:$0xff]  }
  0x42   : > { %4593 = vmatmul.mubr.msk.bf16.gmra.mrb[16].mxu1 %vm1173_vm1, %v5071_v41 }
  0x43   : > { %4401 = vmatmul.mubr.msk.bf16.gmra.mrb[20].mxu0 %vm1173_vm1, %v5015_v15  ;;  %4596 = vmatprep.mubr.msk.bf16.mxu1 %vm1173_vm1, %v5074_v43  ;;  %v5110_v15 = vld [vmem:[%s5300_s19 + $0x3f0] sm:$0xff]  }
  0x44   : > { %4404 = vmatprep.mubr.msk.bf16.mxu0 %vm1173_vm1, %v5016_v16  ;;  %v5051_v16 = vld [vmem:[%s5300_s19 + $0x178] sm:$0xff]  }
  0x4a   : > { %4597 = vmatmul.mubr.msk.bf16.gmra.mrb[20].mxu1 %vm1173_vm1, %v5075_v45 }
  0x4b   : > { %4405 = vmatmul.mubr.msk.bf16.gmra.mrb[24].mxu0 %vm1173_vm1, %v5017_v17  ;;  %4600 = vmatprep.mubr.msk.bf16.mxu1 %vm1173_vm1, %v5078_v47  ;;  %v5111_v17 = vld [vmem:[%s5300_s19 + $0x3f8] sm:$0xff]  }
  0x4c   : > { %4408 = vmatprep.mubr.msk.bf16.mxu0 %vm1173_vm1, %v5018_v18  ;;  %v5052_v18 = vld [vmem:[%s5300_s19 + $0x180] sm:$0xff]  }
  0x52   : > { %4601 = vmatmul.mubr.msk.bf16.gmra.mrb[24].mxu1 %vm1173_vm1, %v5079_v49 }
  0x53   : > { %4409 = vmatmul.mubr.msk.bf16.gmra.mrb[28].mxu0 %vm1173_vm1, %v5019_v19  ;;  %4604 = vmatprep.mubr.msk.bf16.mxu1 %vm1173_vm1, %v5082_v51  ;;  %v2879_v19 = vlaneseq }
  0x54   : > { %4412 = vmatprep.mubr.msk.bf16.mxu0 %vm1173_vm1, %v5020_v20 }
  0x55   : > { %v5458_v20 = vshrl.u32 %v2879_v19, 7 }
  0x5a   : > { %4605 = vmatmul.mubr.msk.bf16.gmra.mrb[28].mxu1 %vm1173_vm1, %v5083_v53  ;;  %v5072_v53 = vld [vmem:[%s5300_s19 + $0x1d0] sm:$0xff]  }
  0x5b   : > { %4413 = vmatmul.mubr.msk.bf16.gmra.mrb[32].mxu0 %vm1173_vm1, %v5021_v21  ;;  %4608 = vmatprep.mubr.msk.bf16.mxu1 %vm1173_vm1, %v5086_v55  ;;  %v2885_v21 = vsub.s32 1, %v5458_v20 }
  0x5c   : > { %4416 = vmatprep.mubr.msk.bf16.mxu0 %vm1173_vm1, %v5022_v22  ;;  %v5466_v22 = vld [vmem:[%s6241_s1] sm:$0xff] }
  0x5d   : > { %v2886_v23 = vrot.slane %v5466_v22, %v2885_v21 }
  0x62   : > { %4609 = vmatmul.mubr.msk.bf16.gmra.mrb[32].mxu1 %vm1173_vm1, %v5087_v57 }
  0x63   : > { %4417 = vmatmul.mubr.msk.bf16.gmra.mrb[36].mxu0 %vm1173_vm1, %v5023_v25  ;;  %4612 = vmatprep.mubr.msk.bf16.mxu1 %vm1173_vm1, %v5090_v59  ;;  %v5056_v25 = vld [vmem:[%s5300_s19 + $0x190] sm:$0xff]  }
  0x64   : > { %4420 = vmatprep.mubr.msk.bf16.mxu0 %vm1173_vm1, %v5024_v26  ;;  %v5057_v26 = vld [vmem:[%s5300_s19 + $0x198] sm:$0xff]  }
  0x6a   : > { %4613 = vmatmul.mubr.msk.bf16.gmra.mrb[36].mxu1 %vm1173_vm1, %v5091_v61 }
  0x6b   : > { %4421 = vmatmul.mubr.msk.bf16.gmra.mrb[40].mxu0 %vm1173_vm1, %v5025_v29  ;;  %4616 = vmatprep.mubr.msk.bf16.mxu1 %vm1173_vm1, %v5094_v63  ;;  %v5064_v29 = vld [vmem:[%s5300_s19 + $0x1b0] sm:$0xff]  }
  0x6c   : > { %4424 = vmatprep.mubr.msk.bf16.mxu0 %vm1173_vm1, %v5026_v30  ;;  %v5485_v30 = vld [vmem:[%s6243_s3] ss:$0 sm:$0xff] }
  0x72   : > { %4617 = vmatmul.mubr.msk.bf16.gmra.mrb[40].mxu1 %vm1173_vm1, %v5095_v1 }
  0x73   : > { %4425 = vmatmul.mubr.msk.bf16.gmra.mrb[44].mxu0 %vm1173_vm1, %v5027_v31  ;;  %4620 = vmatprep.mubr.msk.bf16.mxu1 %vm1173_vm1, %v5098_v3 }
  0x74   : > { %4428 = vmatprep.mubr.msk.bf16.mxu0 %vm1173_vm1, %v5028_v34  ;;  %v5065_v34 = vld [vmem:[%s5300_s19 + $0x1b8] sm:$0xff]  }
  0x7a   : > { %4621 = vmatmul.mubr.msk.bf16.gmra.mrb[44].mxu1 %vm1173_vm1, %v5099_v5  ;;  %v5076_v5 = vld [vmem:[%s5300_s19 + $0x1e0] sm:$0xff]  }
  0x7b   : > { %4429 = vmatmul.mubr.msk.bf16.gmra.mrb[48].mxu0 %vm1173_vm1, %v5029_v35  ;;  %4624 = vmatprep.mubr.msk.bf16.mxu1 %vm1173_vm1, %v5102_v7 }
  0x7c   : > { %4432 = vmatprep.mubr.msk.bf16.mxu0 %vm1173_vm1, %v5030_v38 }
  0x82   : > { %4625 = vmatmul.mubr.msk.bf16.gmra.mrb[48].mxu1 %vm1173_vm1, %v5103_v9 }
  0x83   : > { %4433 = vmatmul.mubr.msk.bf16.gmra.mrb[52].mxu0 %vm1173_vm1, %v5031_v39  ;;  %4628 = vmatprep.mubr.msk.bf16.mxu1 %vm1173_vm1, %v5106_v11 }
  0x84   : > { %4436 = vmatprep.mubr.msk.bf16.mxu0 %vm1173_vm1, %v5032_v42 }
  0x8a   : > { %4629 = vmatmul.mubr.msk.bf16.gmra.mrb[52].mxu1 %vm1173_vm1, %v5107_v13 }
  0x8b   : > { %4437 = vmatmul.mubr.msk.bf16.gmra.mrb[56].mxu0 %vm1173_vm1, %v5033_v44  ;;  %4632 = vmatprep.mubr.msk.bf16.mxu1 %vm1173_vm1, %v5110_v15 }
  0x8c   : > { %4440 = vmatprep.mubr.msk.bf16.mxu0 %vm1173_vm1, %v5034_v46 }
  0x92   : > { %4633 = vmatmul.mubr.msk.bf16.gmra.mrb[56].mxu1 %vm1173_vm1, %v5111_v17 }
  0x93   : > { %4441 = vmatmul.mubr.msk.bf16.gmra.mrb[60].mxu0 %vm1173_vm1, %v5035_v48  ;;  %3023 = vmatprep.mubr.f32.mxu1 %v2886_v23 }
  0x94   : > { %4444 = vmatprep.mubr.msk.bf16.mxu0 %vm1173_vm1, %v5036_v50  ;;  %v5069_v50 = vld [vmem:[%s5300_s19 + $0x1c8] sm:$0xff]  }
  0x9b   : > { %4445 = vmatmul.mubr.msk.bf16.gmra.mrb[64].mxu0 %vm1173_vm1, %v5037_v52 }
  0x9c   : > { %4448 = vmatprep.mubr.msk.bf16.mxu0 %vm1173_vm1, %v5038_v54 }
  0xa3   : > { %4449 = vmatmul.mubr.msk.bf16.gmra.mrb[68].mxu0 %vm1173_vm1, %v5039_v56 }
  0xa4   : > { %4452 = vmatprep.mubr.msk.bf16.mxu0 %vm1173_vm1, %v5040_v58 }
  0xab   : > { %4453 = vmatmul.mubr.msk.bf16.gmra.mrb[72].mxu0 %vm1173_vm1, %v5041_v60 }
  0xac   : > { %4456 = vmatprep.mubr.msk.bf16.mxu0 %vm1173_vm1, %v5042_v62 }
  0xb3   : > { %4457 = vmatmul.mubr.msk.bf16.gmra.mrb[76].mxu0 %vm1173_vm1, %v5043_v0 }
  0xb4   : > { %4460 = vmatprep.mubr.msk.bf16.mxu0 %vm1173_vm1, %v5044_v2  ;;  %v5073_v2 = vld [vmem:[%s5300_s19 + $0x1d8] sm:$0xff]  }
  0xbb   : > { %4461 = vmatmul.mubr.msk.bf16.gmra.mrb[80].mxu0 %vm1173_vm1, %v5045_v4 }
  0xbc   : > { %4464 = vmatprep.mubr.msk.bf16.mxu0 %vm1173_vm1, %v5046_v6 }
  0xc3   : > { %4465 = vmatmul.mubr.msk.bf16.gmra.mrb[84].mxu0 %vm1173_vm1, %v5047_v8 }
  0xc4   : > { %4468 = vmatprep.mubr.msk.bf16.mxu0 %vm1173_vm1, %v5048_v10 }
  0xcb   : > { %4469 = vmatmul.mubr.msk.bf16.gmra.mrb[88].mxu0 %vm1173_vm1, %v5049_v12 }
  0xcc   : > { %4472 = vmatprep.mubr.msk.bf16.mxu0 %vm1173_vm1, %v5050_v14 }
  0xd3   : > { %4473 = vmatmul.mubr.msk.bf16.gmra.mrb[92].mxu0 %vm1173_vm1, %v5051_v16 }
  0xd4   : > { %4476 = vmatprep.mubr.msk.bf16.mxu0 %vm1173_vm1, %v5052_v18  ;;  %v5077_v18 = vld [vmem:[%s5300_s19 + $0x1e8] sm:$0xff]  }
  0xdb   : > { %4477 = vmatmul.mubr.msk.bf16.gmra.mrb[96].mxu0 %vm1173_vm1, %v5053_v24  ;;  %v5080_v24 = vld [vmem:[%s5300_s19 + $0x1f0] sm:$0xff]  }
  0xdc   : > { %4480 = vmatprep.mubr.msk.bf16.mxu0 %vm1173_vm1, %v5056_v25 }
  0xe3   : > { %4481 = vmatmul.mubr.msk.bf16.gmra.mrb[100].mxu0 %vm1173_vm1, %v5057_v26 }
  0xe4   : > { %4484 = vmatprep.mubr.msk.bf16.mxu0 %vm1173_vm1, %v5060_v27 }
  0xeb   : > { %4485 = vmatmul.mubr.msk.bf16.gmra.mrb[104].mxu0 %vm1173_vm1, %v5061_v28 }
  0xec   : > { %4488 = vmatprep.mubr.msk.bf16.mxu0 %vm1173_vm1, %v5064_v29 }
  0xee   : > { %v4382_v31 = vpop.f32.mrb[0].mxu0 }
  0xef   : > { %v1605_v32 = vadd.f32 %v4382_v31, %v5485_v30  ;;  %v1596_v33 = vpop.f32.mrb[1].mxu0 }
  0xf0   : > { %v1597_v35 = vadd.f32 %v5485_v30, %v1596_v33  ;;  %v4383_v36 = vpop.f32.mrb[2].mxu0 }
  0xf1   : > { %v1608_v38 = vadd.f32 %v4383_v36, %v5485_v30  ;;  %v1599_v39 = vpop.f32.mrb[3].mxu0  ;;  %v2621_v41 = vmax.f32 %v1605_v32, 0.0 }
  0xf2   : > { %v1600_v40 = vadd.f32 %v5485_v30, %v1599_v39  ;;  %v2619_v43 = vmax.f32 %v1597_v35, 0.0 }
  0xf3   : > { %v2622_v42 = vmax.f32 %v1608_v38, 0.0  ;;  %4489 = vmatmul.mubr.msk.bf16.gmra.mrb[108].mxu0 %vm1173_vm1, %v5065_v34  ;;  %v5081_v38 = vld [vmem:[%s5300_s19 + $0x1f8] sm:$0xff]  }
  0xf4   : > { %v2620_v44 = vmax.f32 %v1600_v40, 0.0  ;;  %4492 = vmatprep.mubr.msk.bf16.mxu0 %vm1173_vm1, %v5068_v37 }
  0xf5   : > { %v5496_v45 = vpack.c.bf16 %v2622_v42, %v2621_v41  ;;  %v5084_v41 = vld [vmem:[%s5300_s19 + $0x200] sm:$0xff]  }
  0xf6   : > { %v5498_v46 = vpack.c.bf16 %v2620_v44, %v2619_v43  ;;  %v4386_v47 = vpop.f32.mrb[4].mxu0 }
  0xf7   : > { %v1621_v48 = vadd.f32 %v4386_v47, %v5485_v30  ;;  %v1612_v49 = vpop.f32.mrb[5].mxu0 }
  0xf8   : > { %v1613_v51 = vadd.f32 %v5485_v30, %v1612_v49  ;;  %v4387_v52 = vpop.f32.mrb[6].mxu0 }
  0xf9   : > { %v1624_v54 = vadd.f32 %v4387_v52, %v5485_v30  ;;  %v1615_v55 = vpop.f32.mrb[7].mxu0  ;;  %v2625_v57 = vmax.f32 %v1621_v48, 0.0 }
  0xfa   : > { %v1616_v56 = vadd.f32 %v5485_v30, %v1615_v55  ;;  %v2623_v59 = vmax.f32 %v1613_v51, 0.0 }
  0xfb   : > { %v2626_v58 = vmax.f32 %v1624_v54, 0.0  ;;  %4493 = vmatmul.mubr.msk.bf16.gmra.mrb[112].mxu0 %vm1173_vm1, %v5069_v50 }
  0xfc   : > { %v2624_v60 = vmax.f32 %v1616_v56, 0.0  ;;  %4496 = vmatprep.mubr.msk.bf16.mxu0 %vm1173_vm1, %v5072_v53  ;;  %v5085_v56 = vld [vmem:[%s5300_s19 + $0x208] sm:$0xff]  }
  0xfd   : > { %v5508_v61 = vpack.c.bf16 %v2626_v58, %v2625_v57 }
  0xfe   : > { %v5510_v62 = vpack.c.bf16 %v2624_v60, %v2623_v59  ;;  %v4390_v63 = vpop.f32.mrb[8].mxu0  ;;  %v5088_v59 = vld [vmem:[%s5300_s19 + $0x210] sm:$0xff]  }
  0xff   : > { %v1637_v0 = vadd.f32 %v4390_v63, %v5485_v30  ;;  %v1628_v1 = vpop.f32.mrb[9].mxu0 }
 0x100   : > { %v1629_v3 = vadd.f32 %v5485_v30, %v1628_v1  ;;  %v4391_v4 = vpop.f32.mrb[10].mxu0 }
 0x101   : > { %v1640_v6 = vadd.f32 %v4391_v4, %v5485_v30  ;;  %v1631_v7 = vpop.f32.mrb[11].mxu0  ;;  %v2629_v9 = vmax.f32 %v1637_v0, 0.0 }
 0x102   : > { %v1632_v8 = vadd.f32 %v5485_v30, %v1631_v7  ;;  %v2627_v11 = vmax.f32 %v1629_v3, 0.0 }
 0x103   : > { %v2630_v10 = vmax.f32 %v1640_v6, 0.0  ;;  %4497 = vmatmul.mubr.msk.bf16.gmra.mrb[116].mxu0 %vm1173_vm1, %v5073_v2 }
 0x104   : > { %v2628_v12 = vmax.f32 %v1632_v8, 0.0  ;;  %4500 = vmatprep.mubr.msk.bf16.mxu0 %vm1173_vm1, %v5076_v5 }
 0x105   : > { %v5520_v13 = vpack.c.bf16 %v2630_v10, %v2629_v9  ;;  %v5089_v9 = vld [vmem:[%s5300_s19 + $0x218] sm:$0xff]  }
 0x106   : > { %v5522_v14 = vpack.c.bf16 %v2628_v12, %v2627_v11  ;;  %v4394_v15 = vpop.f32.mrb[12].mxu0  ;;  %v5092_v12 = vld [vmem:[%s5300_s19 + $0x220] sm:$0xff]  }
 0x107   : > { %v1653_v16 = vadd.f32 %v4394_v15, %v5485_v30  ;;  %v1644_v17 = vpop.f32.mrb[13].mxu0 }
 0x108   : > { %v1645_v19 = vadd.f32 %v5485_v30, %v1644_v17  ;;  %v4395_v23 = vpop.f32.mrb[14].mxu0 }
 0x109   : > { %v1656_v25 = vadd.f32 %v4395_v23, %v5485_v30  ;;  %v1647_v26 = vpop.f32.mrb[15].mxu0  ;;  %v2633_v28 = vmax.f32 %v1653_v16, 0.0 }
 0x10a   : > { %v1648_v27 = vadd.f32 %v5485_v30, %v1647_v26  ;;  %v2631_v31 = vmax.f32 %v1645_v19, 0.0 }
 0x10b   : > { %v2634_v29 = vmax.f32 %v1656_v25, 0.0  ;;  %4501 = vmatmul.mubr.msk.bf16.gmra.mrb[120].mxu0 %vm1173_vm1, %v5077_v18 }
 0x10c   : > { %v2632_v32 = vmax.f32 %v1648_v27, 0.0  ;;  %4504 = vmatprep.mubr.msk.bf16.mxu0 %vm1173_vm1, %v5080_v24 }
 0x10d   : > { %v5532_v33 = vpack.c.bf16 %v2634_v29, %v2633_v28  ;;  %v5093_v28 = vld [vmem:[%s5300_s19 + $0x228] sm:$0xff]  }
 0x10e   : > { %v5534_v34 = vpack.c.bf16 %v2632_v32, %v2631_v31  ;;  %v4398_v35 = vpop.f32.mrb[16].mxu0  ;;  %v5096_v32 = vld [vmem:[%s5300_s19 + $0x230] sm:$0xff]  }
 0x10f   : > { %v1669_v36 = vadd.f32 %v4398_v35, %v5485_v30  ;;  %v1660_v37 = vpop.f32.mrb[17].mxu0 }
 0x110   : > { %v1661_v39 = vadd.f32 %v5485_v30, %v1660_v37  ;;  %v4399_v40 = vpop.f32.mrb[18].mxu0 }
 0x111   : > { %v1672_v42 = vadd.f32 %v4399_v40, %v5485_v30  ;;  %v1663_v43 = vpop.f32.mrb[19].mxu0  ;;  %v2637_v47 = vmax.f32 %v1669_v36, 0.0 }
 0x112   : > { %v1664_v44 = vadd.f32 %v5485_v30, %v1663_v43  ;;  %v2635_v49 = vmax.f32 %v1661_v39, 0.0 }
 0x113   : > { %v2638_v48 = vmax.f32 %v1672_v42, 0.0  ;;  %4505 = vmatmul.mubr.msk.bf16.gmra.mrb[124].mxu0 %vm1173_vm1, %v5081_v38 }
 0x114   : > { %v2636_v50 = vmax.f32 %v1664_v44, 0.0  ;;  %4508 = vmatprep.mubr.msk.bf16.mxu0 %vm1173_vm1, %v5084_v41 }
 0x115   : > { %v4675_v51 = vpack.c.bf16 %v2638_v48, %v2637_v47  ;;  %v5097_v47 = vld [vmem:[%s5300_s19 + $0x238] sm:$0xff]  }
 0x116   : > { %v4671_v52 = vpack.c.bf16 %v2636_v50, %v2635_v49  ;;  %v4402_v53 = vpop.f32.mrb[20].mxu0  ;;  %v5100_v50 = vld [vmem:[%s5300_s19 + $0x240] sm:$0xff]  }
 0x117   : > { %v1685_v54 = vadd.f32 %v4402_v53, %v5485_v30  ;;  %v1676_v55 = vpop.f32.mrb[21].mxu0 }
 0x118   : > { %v1677_v57 = vadd.f32 %v5485_v30, %v1676_v55  ;;  %v4403_v58 = vpop.f32.mrb[22].mxu0  ;;  %4672 = vmatprep.subr.bf16.mxu1 %v4671_v52 }
 0x119   : > { %v1688_v60 = vadd.f32 %v4403_v58, %v5485_v30  ;;  %v1679_v63 = vpop.f32.mrb[23].mxu0  ;;  %4674 = vmatpush3.bf16.msra.mxu1 %v5498_v46  ;;  %v2641_v1 = vmax.f32 %v1685_v54, 0.0 }
 0x11a   : > { %v1680_v0 = vadd.f32 %v5485_v30, %v1679_v63  ;;  %4676 = vmatprep.subr.bf16.mxu1 %v4675_v51  ;;  %v2639_v3 = vmax.f32 %v1677_v57, 0.0  ;;  %v2881_v51 = vsub.s32 0, %v5458_v20 }
 0x11b   : > { %v2642_v2 = vmax.f32 %v1688_v60, 0.0  ;;  %4509 = vmatmul.mubr.msk.bf16.gmra.mrb[128].mxu0 %vm1173_vm1, %v5085_v56 }
 0x11c   : > { %v2640_v4 = vmax.f32 %v1680_v0, 0.0  ;;  %4512 = vmatprep.mubr.msk.bf16.mxu0 %vm1173_vm1, %v5088_v59  ;;  %v2882_v59 = vrot.slane %v5466_v22, %v2881_v51 }
 0x11d   : > { %v4683_v5 = vpack.c.bf16 %v2642_v2, %v2641_v1  ;;  %4678 = vmatpush3.bf16.msra.mxu1 %v5496_v45 }
 0x11e   : > { %v4679_v6 = vpack.c.bf16 %v2640_v4, %v2639_v3  ;;  %v4406_v7 = vpop.f32.mrb[24].mxu0  ;;  %v5101_v3 = vld [vmem:[%s5300_s19 + $0x248] sm:$0xff]  }
 0x11f   : > { %v1701_v8 = vadd.f32 %v4406_v7, %v5485_v30  ;;  %v1692_v46 = vpop.f32.mrb[25].mxu0 }
 0x120   : > { %v1693_v10 = vadd.f32 %v5485_v30, %v1692_v46  ;;  %v4407_v11 = vpop.f32.mrb[26].mxu0  ;;  %4680 = vmatprep.subr.bf16.mxu1 %v4679_v6  ;;  %v5104_v6 = vld [vmem:[%s5300_s19 + $0x250] sm:$0xff]  }
 0x121   : > { %v1704_v15 = vadd.f32 %v4407_v11, %v5485_v30  ;;  %v1695_v16 = vpop.f32.mrb[27].mxu0  ;;  %4682 = vmatpush3.bf16.msra.mxu1 %v5510_v62  ;;  %v2645_v45 = vmax.f32 %v1701_v8, 0.0 }
 0x122   : > { %v1696_v17 = vadd.f32 %v5485_v30, %v1695_v16  ;;  %4684 = vmatprep.subr.bf16.mxu1 %v4683_v5  ;;  %v2643_v19 = vmax.f32 %v1693_v10, 0.0 }
 0x123   : > { %v2646_v18 = vmax.f32 %v1704_v15, 0.0  ;;  %4513 = vmatmul.mubr.msk.bf16.gmra.mrb[132].mxu0 %vm1173_vm1, %v5089_v9 }
 0x124   : > { %v2644_v23 = vmax.f32 %v1696_v17, 0.0  ;;  %4516 = vmatprep.mubr.msk.bf16.mxu0 %vm1173_vm1, %v5092_v12 }
 0x125   : > { %v4691_v24 = vpack.c.bf16 %v2646_v18, %v2645_v45  ;;  %4686 = vmatpush3.bf16.msra.mxu1 %v5508_v61  ;;  %v5105_v18 = vld [vmem:[%s5300_s19 + $0x258] sm:$0xff]  }
 0x126   : > { %v4687_v25 = vpack.c.bf16 %v2644_v23, %v2643_v19  ;;  %v4410_v26 = vpop.f32.mrb[28].mxu0 }
 0x127   : > { %v1717_v27 = vadd.f32 %v4410_v26, %v5485_v30  ;;  %v1708_v62 = vpop.f32.mrb[29].mxu0 }
 0x128   : > { %v1709_v29 = vadd.f32 %v5485_v30, %v1708_v62  ;;  %v4411_v31 = vpop.f32.mrb[30].mxu0  ;;  %4688 = vmatprep.subr.bf16.mxu1 %v4687_v25 }
 0x129   : > { %v1720_v35 = vadd.f32 %v4411_v31, %v5485_v30  ;;  %v1711_v36 = vpop.f32.mrb[31].mxu0  ;;  %4690 = vmatpush3.bf16.msra.mxu1 %v5522_v14  ;;  %v2649_v61 = vmax.f32 %v1717_v27, 0.0 }
 0x12a   : > { %v1712_v37 = vadd.f32 %v5485_v30, %v1711_v36  ;;  %4692 = vmatprep.subr.bf16.mxu1 %v4691_v24  ;;  %v2647_v39 = vmax.f32 %v1709_v29, 0.0  ;;  %v5108_v24 = vld [vmem:[%s5300_s19 + $0x260] sm:$0xff]  }
 0x12b   : > { %v2650_v38 = vmax.f32 %v1720_v35, 0.0  ;;  %4517 = vmatmul.mubr.msk.bf16.gmra.mrb[136].mxu0 %vm1173_vm1, %v5093_v28 }
 0x12c   : > { %v2648_v40 = vmax.f32 %v1712_v37, 0.0  ;;  %4520 = vmatprep.mubr.msk.bf16.mxu0 %vm1173_vm1, %v5096_v32 }
 0x12d   : > { %v4699_v41 = vpack.c.bf16 %v2650_v38, %v2649_v61  ;;  %4694 = vmatpush3.bf16.msra.mxu1 %v5520_v13  ;;  %v2893_v13 = vsub.s32 3, %v5458_v20  ;;  %v5109_v38 = vld [vmem:[%s5300_s19 + $0x268] sm:$0xff]  }
 0x12e   : > { %v4695_v42 = vpack.c.bf16 %v2648_v40, %v2647_v39  ;;  %v4414_v43 = vpop.f32.mrb[32].mxu0 }
 0x12f   : > { %v1733_v44 = vadd.f32 %v4414_v43, %v5485_v30  ;;  %v1724_v14 = vpop.f32.mrb[33].mxu0  ;;  %v2894_v60 = vrot.slane %v5466_v22, %v2893_v13 }
 0x130   : > { %v1725_v48 = vadd.f32 %v5485_v30, %v1724_v14  ;;  %v4415_v49 = vpop.f32.mrb[34].mxu0  ;;  %4696 = vmatprep.subr.bf16.mxu1 %v4695_v42 }
 0x131   : > { %v1736_v52 = vadd.f32 %v4415_v49, %v5485_v30  ;;  %v1727_v53 = vpop.f32.mrb[35].mxu0  ;;  %4698 = vmatpush3.bf16.msra.mxu1 %v5534_v34  ;;  %v2653_v55 = vmax.f32 %v1733_v44, 0.0 }
 0x132   : > { %v1728_v54 = vadd.f32 %v5485_v30, %v1727_v53  ;;  %4700 = vmatprep.subr.bf16.mxu1 %v4699_v41  ;;  %v2651_v57 = vmax.f32 %v1725_v48, 0.0  ;;  %v5112_v41 = vld [vmem:[%s5300_s19 + $0x270] sm:$0xff]  }
 0x133   : > { %v2654_v56 = vmax.f32 %v1736_v52, 0.0  ;;  %4521 = vmatmul.mubr.msk.bf16.gmra.mrb[140].mxu0 %vm1173_vm1, %v5097_v47 }
 0x134   : > { %v2652_v58 = vmax.f32 %v1728_v54, 0.0  ;;  %4524 = vmatprep.mubr.msk.bf16.mxu0 %vm1173_vm1, %v5100_v50 }
 0x135   : > { %v5588_v34 = vpack.c.bf16 %v2654_v56, %v2653_v55  ;;  %4702 = vmatpush3.bf16.msra.mxu1 %v5532_v33  ;;  %v5113_v56 = vld [vmem:[%s5300_s19 + $0x278] sm:$0xff]  }
 0x136   : > { %v5594_v63 = vpack.c.bf16 %v2652_v58, %v2651_v57  ;;  %v4418_v0 = vpop.f32.mrb[36].mxu0 }
 0x137   : > { %v1749_v1 = vadd.f32 %v4418_v0, %v5485_v30  ;;  %v1740_v2 = vpop.f32.mrb[37].mxu0 }
 0x138   : > { %v1741_v4 = vadd.f32 %v5485_v30, %v1740_v2  ;;  %v4419_v5 = vpop.f32.mrb[38].mxu0  ;;  %3024 = vmatmul.mubr.f32.vlgmr.msra.gmra.mrb[60].mxu1 %v2882_v59  ;;  %v5114_v59 = vld [vmem:[%s5300_s19 + $0x280] sm:$0xff]  }
 0x139   : > { %v1752_v7 = vadd.f32 %v4419_v5, %v5485_v30  ;;  %v1743_v33 = vpop.f32.mrb[39].mxu0  ;;  %3093 = vmatprep.mubr.f32.mxu1 %v2894_v60  ;;  %v2657_v46 = vmax.f32 %v1749_v1, 0.0 }
 0x13a   : > { %v1744_v8 = vadd.f32 %v5485_v30, %v1743_v33  ;;  %v2655_v10 = vmax.f32 %v1741_v4, 0.0 }
 0x13b   : > { %v2658_v9 = vmax.f32 %v1752_v7, 0.0  ;;  %4525 = vmatmul.mubr.msk.bf16.gmra.mrb[144].mxu0 %vm1173_vm1, %v5101_v3 }
 0x13c   : > { %v2656_v11 = vmax.f32 %v1744_v8, 0.0  ;;  %4528 = vmatprep.mubr.msk.bf16.mxu0 %vm1173_vm1, %v5104_v6 }
 0x13d   : > { %v5604_v12 = vpack.c.bf16 %v2658_v9, %v2657_v46  ;;  %v5115_v9 = vld [vmem:[%s5300_s19 + $0x288] sm:$0xff]  }
 0x13e   : > { %v5606_v15 = vpack.c.bf16 %v2656_v11, %v2655_v10  ;;  %v4422_v16 = vpop.f32.mrb[40].mxu0 }
 0x13f   : > { %v1765_v17 = vadd.f32 %v4422_v16, %v5485_v30  ;;  %v1756_v45 = vpop.f32.mrb[41].mxu0  ;;  %v5116_v16 = vld [vmem:[%s5300_s19 + $0x290] sm:$0xff]  }
 0x140   : > { %v1757_v19 = vadd.f32 %v5485_v30, %v1756_v45  ;;  %v4423_v23 = vpop.f32.mrb[42].mxu0 }
 0x141   : > { %v1768_v25 = vadd.f32 %v4423_v23, %v5485_v30  ;;  %v1759_v26 = vpop.f32.mrb[43].mxu0  ;;  %v2661_v62 = vmax.f32 %v1765_v17, 0.0 }
 0x142   : > { %v1760_v27 = vadd.f32 %v5485_v30, %v1759_v26  ;;  %v2659_v29 = vmax.f32 %v1757_v19, 0.0 }
 0x143   : > { %v2662_v28 = vmax.f32 %v1768_v25, 0.0  ;;  %4529 = vmatmul.mubr.msk.bf16.gmra.mrb[148].mxu0 %vm1173_vm1, %v5105_v18 }
 0x144   : > { %v2660_v31 = vmax.f32 %v1760_v27, 0.0  ;;  %4532 = vmatprep.mubr.msk.bf16.mxu0 %vm1173_vm1, %v5108_v24 }
 0x145   : > { %v5616_v32 = vpack.c.bf16 %v2662_v28, %v2661_v62 }
 0x146   : > { %v5618_v35 = vpack.c.bf16 %v2660_v31, %v2659_v29  ;;  %v4426_v36 = vpop.f32.mrb[44].mxu0  ;;  %v5117_v29 = vld [vmem:[%s5300_s19 + $0x298] sm:$0xff]  }
 0x147   : > { %v1781_v37 = vadd.f32 %v4426_v36, %v5485_v30  ;;  %v1772_v61 = vpop.f32.mrb[45].mxu0 }
 0x148   : > { %v1773_v39 = vadd.f32 %v5485_v30, %v1772_v61  ;;  %v4427_v40 = vpop.f32.mrb[46].mxu0 }
 0x149   : > { %v1784_v42 = vadd.f32 %v4427_v40, %v5485_v30  ;;  %v1775_v43 = vpop.f32.mrb[47].mxu0  ;;  %v2665_v14 = vmax.f32 %v1781_v37, 0.0  ;;  %v5118_v37 = vld [vmem:[%s5300_s19 + $0x2a0] sm:$0xff]  }
 0x14a   : > { %v1776_v44 = vadd.f32 %v5485_v30, %v1775_v43  ;;  %v2663_v48 = vmax.f32 %v1773_v39, 0.0 }
 0x14b   : > { %v2666_v47 = vmax.f32 %v1784_v42, 0.0  ;;  %4533 = vmatmul.mubr.msk.bf16.gmra.mrb[152].mxu0 %vm1173_vm1, %v5109_v38 }
 0x14c   : > { %v2664_v49 = vmax.f32 %v1776_v44, 0.0  ;;  %4536 = vmatprep.mubr.msk.bf16.mxu0 %vm1173_vm1, %v5112_v41 }
 0x14d   : > { %v5628_v50 = vpack.c.bf16 %v2666_v47, %v2665_v14 }
 0x14e   : > { %v5630_v52 = vpack.c.bf16 %v2664_v49, %v2663_v48  ;;  %v4430_v53 = vpop.f32.mrb[48].mxu0  ;;  %v5119_v48 = vld [vmem:[%s5300_s19 + $0x2a8] sm:$0xff]  }
 0x14f   : > { %v1797_v54 = vadd.f32 %v4430_v53, %v5485_v30  ;;  %v1788_v55 = vpop.f32.mrb[49].mxu0 }
 0x150   : > { %v1789_v57 = vadd.f32 %v5485_v30, %v1788_v55  ;;  %v4431_v58 = vpop.f32.mrb[50].mxu0 }
 0x151   : > { %v1800_v60 = vadd.f32 %v4431_v58, %v5485_v30  ;;  %v1791_v0 = vpop.f32.mrb[51].mxu0  ;;  %v2669_v2 = vmax.f32 %v1797_v54, 0.0  ;;  %v5120_v54 = vld [vmem:[%s5300_s19 + $0x2b0] sm:$0xff]  }
 0x152   : > { %v1792_v1 = vadd.f32 %v5485_v30, %v1791_v0  ;;  %v2667_v4 = vmax.f32 %v1789_v57, 0.0 }
 0x153   : > { %v2670_v3 = vmax.f32 %v1800_v60, 0.0  ;;  %4537 = vmatmul.mubr.msk.bf16.gmra.mrb[156].mxu0 %vm1173_vm1, %v5113_v56 }
 0x154   : > { %v2668_v5 = vmax.f32 %v1792_v1, 0.0  ;;  %4540 = vmatprep.mubr.msk.bf16.mxu0 %vm1173_vm1, %v5114_v59 }
 0x155   : > { %v4707_v6 = vpack.c.bf16 %v2670_v3, %v2669_v2 }
 0x156   : > { %v4703_v7 = vpack.c.bf16 %v2668_v5, %v2667_v4  ;;  %v4434_v33 = vpop.f32.mrb[52].mxu0  ;;  %v5121_v4 = vld [vmem:[%s5300_s19 + $0x2b8] sm:$0xff]  }
 0x157   : > { %v1813_v8 = vadd.f32 %v4434_v33, %v5485_v30  ;;  %v1804_v46 = vpop.f32.mrb[53].mxu0  ;;  %v2889_v33 = vsub.s32 2, %v5458_v20 }
 0x158   : > { %v1805_v10 = vadd.f32 %v5485_v30, %v1804_v46  ;;  %v4435_v11 = vpop.f32.mrb[54].mxu0  ;;  %4704 = vmatprep.subr.bf16.mxu1 %v4703_v7  ;;  %v5122_v7 = vld [vmem:[%s5300_s19 + $0x2c0] sm:$0xff]  }
 0x159   : > { %v1816_v17 = vadd.f32 %v4435_v11, %v5485_v30  ;;  %v1807_v45 = vpop.f32.mrb[55].mxu0  ;;  %4706 = vmatpush3.bf16.msra.mxu1 %v5594_v63  ;;  %v2673_v19 = vmax.f32 %v1813_v8, 0.0 }
 0x15a   : > { %v1808_v18 = vadd.f32 %v5485_v30, %v1807_v45  ;;  %4708 = vmatprep.subr.bf16.mxu1 %v4707_v6  ;;  %v2671_v24 = vmax.f32 %v1805_v10, 0.0  ;;  %v2890_v45 = vrot.slane %v5466_v22, %v2889_v33 }
 0x15b   : > { %v2674_v23 = vmax.f32 %v1816_v17, 0.0  ;;  %4541 = vmatmul.mubr.msk.bf16.gmra.mrb[160].mxu0 %vm1173_vm1, %v5115_v9 }
 0x15c   : > { %v2672_v25 = vmax.f32 %v1808_v18, 0.0  ;;  %4544 = vmatprep.mubr.msk.bf16.mxu0 %vm1173_vm1, %v5116_v16 }
 0x15d   : > { %v4715_v26 = vpack.c.bf16 %v2674_v23, %v2673_v19  ;;  %4710 = vmatpush3.bf16.msra.mxu1 %v5588_v34 }
 0x15e   : > { %v4711_v27 = vpack.c.bf16 %v2672_v25, %v2671_v24  ;;  %v4438_v62 = vpop.f32.mrb[56].mxu0 }
 0x15f   : > { %v1829_v28 = vadd.f32 %v4438_v62, %v5485_v30  ;;  %v1820_v63 = vpop.f32.mrb[57].mxu0 }
 0x160   : > { %v1821_v31 = vadd.f32 %v5485_v30, %v1820_v63  ;;  %v4439_v36 = vpop.f32.mrb[58].mxu0  ;;  %4712 = vmatprep.subr.bf16.mxu1 %v4711_v27 }
 0x161   : > { %v1832_v61 = vadd.f32 %v4439_v36, %v5485_v30  ;;  %v1823_v38 = vpop.f32.mrb[59].mxu0  ;;  %4714 = vmatpush3.bf16.msra.mxu1 %v5606_v15  ;;  %v2677_v34 = vmax.f32 %v1829_v28, 0.0  ;;  %v5124_v28 = vld [vmem:[%s5300_s19 + $0x2d0] sm:$0xff]  }
 0x162   : > { %v1824_v39 = vadd.f32 %v5485_v30, %v1823_v38  ;;  %4716 = vmatprep.subr.bf16.mxu1 %v4715_v26  ;;  %v2675_v41 = vmax.f32 %v1821_v31, 0.0  ;;  %v5123_v26 = vld [vmem:[%s5300_s19 + $0x2c8] sm:$0xff]  }
 0x163   : > { %v2678_v40 = vmax.f32 %v1832_v61, 0.0  ;;  %4545 = vmatmul.mubr.msk.bf16.gmra.mrb[164].mxu0 %vm1173_vm1, %v5117_v29 }
 0x164   : > { %v2676_v42 = vmax.f32 %v1824_v39, 0.0  ;;  %4548 = vmatprep.mubr.msk.bf16.mxu0 %vm1173_vm1, %v5118_v37 }
 0x165   : > { %v4723_v43 = vpack.c.bf16 %v2678_v40, %v2677_v34  ;;  %4718 = vmatpush3.bf16.msra.mxu1 %v5604_v12 }
 0x166   : > { %v4719_v44 = vpack.c.bf16 %v2676_v42, %v2675_v41  ;;  %v4442_v14 = vpop.f32.mrb[60].mxu0  ;;  %v5125_v41 = vld [vmem:[%s5300_s19 + $0x2d8] sm:$0xff]  }
 0x167   : > { %v1845_v47 = vadd.f32 %v4442_v14, %v5485_v30  ;;  %v1836_v15 = vpop.f32.mrb[61].mxu0 }
 0x168   : > { %v1837_v49 = vadd.f32 %v5485_v30, %v1836_v15  ;;  %v4443_v53 = vpop.f32.mrb[62].mxu0  ;;  %4720 = vmatprep.subr.bf16.mxu1 %v4719_v44  ;;  %v5126_v44 = vld [vmem:[%s5300_s19 + $0x2e0] sm:$0xff]  }
 0x169   : > { %v1848_v55 = vadd.f32 %v4443_v53, %v5485_v30  ;;  %v1839_v56 = vpop.f32.mrb[63].mxu0  ;;  %4722 = vmatpush3.bf16.msra.mxu1 %v5618_v35  ;;  %v2681_v12 = vmax.f32 %v1845_v47, 0.0 }
 0x16a   : > { %v1840_v57 = vadd.f32 %v5485_v30, %v1839_v56  ;;  %4724 = vmatprep.subr.bf16.mxu1 %v4723_v43  ;;  %v2679_v59 = vmax.f32 %v1837_v49, 0.0 }
 0x16b   : > { %v2682_v58 = vmax.f32 %v1848_v55, 0.0  ;;  %4549 = vmatmul.mubr.msk.bf16.gmra.mrb[168].mxu0 %vm1173_vm1, %v5119_v48 }
 0x16c   : > { %v2680_v60 = vmax.f32 %v1840_v57, 0.0  ;;  %4552 = vmatprep.mubr.msk.bf16.mxu0 %vm1173_vm1, %v5120_v54 }
 0x16d   : > { %v4731_v0 = vpack.c.bf16 %v2682_v58, %v2681_v12  ;;  %4726 = vmatpush3.bf16.msra.mxu1 %v5616_v32  ;;  %v2901_v32 = vsub.s32 5, %v5458_v20 }
 0x16e   : > { %v4727_v1 = vpack.c.bf16 %v2680_v60, %v2679_v59  ;;  %v4446_v2 = vpop.f32.mrb[64].mxu0  ;;  %v5127_v59 = vld [vmem:[%s5300_s19 + $0x2e8] sm:$0xff]  }
 0x16f   : > { %v1861_v3 = vadd.f32 %v4446_v2, %v5485_v30  ;;  %v1852_v35 = vpop.f32.mrb[65].mxu0  ;;  %v2902_v18 = vrot.slane %v5466_v22, %v2901_v32 }
 0x170   : > { %v1853_v5 = vadd.f32 %v5485_v30, %v1852_v35  ;;  %v4447_v6 = vpop.f32.mrb[66].mxu0  ;;  %4728 = vmatprep.subr.bf16.mxu1 %v4727_v1  ;;  %v5128_v1 = vld [vmem:[%s5300_s19 + $0x2f0] sm:$0xff]  }
 0x171   : > { %v1864_v8 = vadd.f32 %v4447_v6, %v5485_v30  ;;  %v1855_v46 = vpop.f32.mrb[67].mxu0  ;;  %4730 = vmatpush3.bf16.msra.mxu1 %v5630_v52  ;;  %v2685_v10 = vmax.f32 %v1861_v3, 0.0 }
 0x172   : > { %v1856_v9 = vadd.f32 %v5485_v30, %v1855_v46  ;;  %4732 = vmatprep.subr.bf16.mxu1 %v4731_v0  ;;  %v2683_v16 = vmax.f32 %v1853_v5, 0.0 }
 0x173   : > { %v2686_v11 = vmax.f32 %v1864_v8, 0.0  ;;  %4553 = vmatmul.mubr.msk.bf16.gmra.mrb[172].mxu0 %vm1173_vm1, %v5121_v4 }
 0x174   : > { %v2684_v17 = vmax.f32 %v1856_v9, 0.0  ;;  %4556 = vmatprep.mubr.msk.bf16.mxu0 %vm1173_vm1, %v5122_v7 }
 0x175   : > { %v5684_v52 = vpack.c.bf16 %v2686_v11, %v2685_v10  ;;  %4734 = vmatpush3.bf16.msra.mxu1 %v5628_v50 }
 0x176   : > { %v5690_v19 = vpack.c.bf16 %v2684_v17, %v2683_v16  ;;  %v4450_v23 = vpop.f32.mrb[68].mxu0  ;;  %v5129_v16 = vld [vmem:[%s5300_s19 + $0x2f8] sm:$0xff]  }
 0x177   : > { %v1877_v24 = vadd.f32 %v4450_v23, %v5485_v30  ;;  %v1868_v25 = vpop.f32.mrb[69].mxu0 }
 0x178   : > { %v1869_v27 = vadd.f32 %v5485_v30, %v1868_v25  ;;  %v4451_v62 = vpop.f32.mrb[70].mxu0  ;;  %3094 = vmatmul.mubr.f32.vlgmr.msra.gmra.mrb[62].mxu1 %v2890_v45 }
 0x179   : > { %v1880_v63 = vadd.f32 %v4451_v62, %v5485_v30  ;;  %v1871_v50 = vpop.f32.mrb[71].mxu0  ;;  %3163 = vmatprep.mubr.f32.mxu1 %v2902_v18  ;;  %v2689_v29 = vmax.f32 %v1877_v24, 0.0  ;;  %v5130_v18 = vld [vmem:[%s5300_s19 + $0x300] sm:$0xff]  }
 0x17a   : > { %v1872_v22 = vadd.f32 %v5485_v30, %v1871_v50  ;;  %v2687_v36 = vmax.f32 %v1869_v27, 0.0 }
 0x17b   : > { %v2690_v31 = vmax.f32 %v1880_v63, 0.0  ;;  %4557 = vmatmul.mubr.msk.bf16.gmra.mrb[176].mxu0 %vm1173_vm1, %v5123_v26 }
 0x17c   : > { %v2688_v37 = vmax.f32 %v1872_v22, 0.0  ;;  %4560 = vmatprep.mubr.msk.bf16.mxu0 %vm1173_vm1, %v5124_v28 }
 0x17d   : > { %v5700_v61 = vpack.c.bf16 %v2690_v31, %v2689_v29 }
 0x17e   : > { %v5702_v38 = vpack.c.bf16 %v2688_v37, %v2687_v36  ;;  %v4454_v39 = vpop.f32.mrb[72].mxu0  ;;  %v5131_v36 = vld [vmem:[%s5300_s19 + $0x308] sm:$0xff]   ;;  %s242_s19 = sand.u32 1, %s5189_s22  }
 0x17f   : > { %v1893_v34 = vadd.f32 %v4454_v39, %v5485_v30  ;;  %v1884_v40 = vpop.f32.mrb[73].mxu0  ;;  %s243_s29 = scalar_lea.vmem [#allocation2], %s242_s19  ;;  %s3609_s13 = scalar_lea.sflag [#allocation3], %s242_s19 }
 0x180   : > { %v1885_v42 = vadd.f32 %v5485_v30, %v1884_v40  ;;  %v4455_v43 = vpop.f32.mrb[74].mxu0  ;;  %s3621_s9 = sshll.u32 %s243_s29, 4  ;;  %s6200_s9 = int_to_ptr.vmem [resolvable:$true] %s3621_s9 }
 0x181   : > { %v1896_v14 = vadd.f32 %v4455_v43, %v5485_v30  ;;  %v1887_v47 = vpop.f32.mrb[75].mxu0  ;;  %v2693_v48 = vmax.f32 %v1893_v34, 0.0  ;;  %s5135_s14 = scalar_lea.vmem %s6200_s9, 16  ;;  %p5142_p0 = scmp.lt.s32.totalorder %s6200_s9, %s5140_s15 }
 0x182   : > { %v1888_v15 = vadd.f32 %v5485_v30, %v1887_v47  ;;  %v2691_v53 = vmax.f32 %v1885_v42, 0.0  ;;  %p5136_p11 = scmp.ne.s32.totalorder %s6200_s9, %s5135_s14  ;;  %p5143_p1 = scmp.lt.s32.totalorder %s5141_s16, %s5135_s14 }
 0x183   : > { %v2694_v49 = vmax.f32 %v1896_v14, 0.0  ;;  %4561 = vmatmul.mubr.msk.bf16.gmra.mrb[180].mxu0 %vm1173_vm1, %v5125_v41 }
 0x184   : > { %v2692_v54 = vmax.f32 %v1888_v15, 0.0  ;;  %4564 = vmatprep.mubr.msk.bf16.mxu0 %vm1173_vm1, %v5126_v44  ;;  %p5137_p12 = pnand %p5136_p11, %p5276_p5  ;;  %p5144_p2 = por %p5143_p1, %p5142_p0 }
 0x185   : > { %v5712_v55 = vpack.c.bf16 %v2694_v49, %v2693_v48 }
 0x186   : > { %v5714_v56 = vpack.c.bf16 %v2692_v54, %v2691_v53  ;;  %v4458_v57 = vpop.f32.mrb[76].mxu0  ;;  %p5138_p13 = pneg %p5137_p12 }
 0x187   : > { %v1909_v12 = vadd.f32 %v4458_v57, %v5485_v30  ;;  %v1900_v58 = vpop.f32.mrb[77].mxu0 }
 0x188   : > { %v1901_v60 = vadd.f32 %v5485_v30, %v1900_v58  ;;  %v4459_v0 = vpop.f32.mrb[78].mxu0  ;;  %p5145_p3 = pnand %p5144_p2, %p5138_p13 }
 0x189   : > { %v1912_v2 = vadd.f32 %v4459_v0, %v5485_v30  ;;  %v1903_v3 = vpop.f32.mrb[79].mxu0  ;;  %v2697_v4 = vmax.f32 %v1909_v12, 0.0 }
 0x18a   : > { %v1904_v35 = vadd.f32 %v5485_v30, %v1903_v3  ;;  %v2695_v6 = vmax.f32 %v1901_v60, 0.0 }
 0x18b   : > { %v2698_v5 = vmax.f32 %v1912_v2, 0.0  ;;  %4565 = vmatmul.mubr.msk.bf16.gmra.mrb[184].mxu0 %vm1173_vm1, %v5127_v59 }
 0x18c   : > { %v2696_v7 = vmax.f32 %v1904_v35, 0.0  ;;  %4568 = vmatprep.mubr.msk.bf16.mxu0 %vm1173_vm1, %v5128_v1 }
 0x18d   : > { %v5724_v8 = vpack.c.bf16 %v2698_v5, %v2697_v4 }
 0x18e   : > { %v5726_v46 = vpack.c.bf16 %v2696_v7, %v2695_v6  ;;  %v4462_v9 = vpop.f32.mrb[80].mxu0 }
 0x18f   : > { %v1925_v10 = vadd.f32 %v4462_v9, %v5485_v30  ;;  %v1916_v11 = vpop.f32.mrb[81].mxu0 }
 0x190   : > { %v1917_v17 = vadd.f32 %v5485_v30, %v1916_v11  ;;  %v4463_v45 = vpop.f32.mrb[82].mxu0 }
 0x191   : > { %v1928_v23 = vadd.f32 %v4463_v45, %v5485_v30  ;;  %v1919_v24 = vpop.f32.mrb[83].mxu0  ;;  %v2701_v26 = vmax.f32 %v1925_v10, 0.0 }
 0x192   : > { %v1920_v25 = vadd.f32 %v5485_v30, %v1919_v24  ;;  %v2699_v62 = vmax.f32 %v1917_v17, 0.0 }
 0x193   : > { %v2702_v27 = vmax.f32 %v1928_v23, 0.0  ;;  %4569 = vmatmul.mubr.msk.bf16.gmra.mrb[188].mxu0 %vm1173_vm1, %v5129_v16 }
 0x194   : > { %v2700_v28 = vmax.f32 %v1920_v25, 0.0  ;;  %4572 = vmatprep.mubr.msk.bf16.mxu0 %vm1173_vm1, %v5130_v18 }
 0x195   : > { %v4739_v63 = vpack.c.bf16 %v2702_v27, %v2701_v26  ;;  %v6248_v27 = vsub.s32 7, %v5458_v20 }
 0x196   : > { %v4735_v50 = vpack.c.bf16 %v2700_v28, %v2699_v62  ;;  %v4466_v22 = vpop.f32.mrb[84].mxu0 }
 0x197   : > { %v1941_v29 = vadd.f32 %v4466_v22, %v5485_v30  ;;  %v1932_v31 = vpop.f32.mrb[85].mxu0 }
 0x198   : > { %v1933_v37 = vadd.f32 %v5485_v30, %v1932_v31  ;;  %v4467_v39 = vpop.f32.mrb[86].mxu0  ;;  %4736 = vmatprep.subr.bf16.mxu1 %v4735_v50 }
 0x199   : > { %v1944_v34 = vadd.f32 %v4467_v39, %v5485_v30  ;;  %v1935_v40 = vpop.f32.mrb[87].mxu0  ;;  %4738 = vmatpush3.bf16.msra.mxu1 %v5690_v19  ;;  %v2705_v42 = vmax.f32 %v1941_v29, 0.0  ;;  %v5766_v39 = vld [vmem:[%s6241_s1] sm:$0xff] }
 0x19a   : > { %v1936_v41 = vadd.f32 %v5485_v30, %v1935_v40  ;;  %4740 = vmatprep.subr.bf16.mxu1 %v4739_v63  ;;  %v2703_v44 = vmax.f32 %v1933_v37, 0.0  ;;  %v4578_v63 = vpop.f32.mrb[0].mxu1 }
 0x19b   : > { %v2706_v43 = vmax.f32 %v1944_v34, 0.0  ;;  %4573 = vmatmul.mubr.msk.bf16.gmra.mrb[192].mxu0 %vm1173_vm1, %v5131_v36  ;;  %v2380_v50 = vpop.f32.mrb[1].mxu1 }
 0x19c   : > { %v2704_v14 = vmax.f32 %v1936_v41, 0.0  ;;  %v4579_v31 = vpop.f32.mrb[2].mxu1 }
 0x19d   : > { %v4747_v47 = vpack.c.bf16 %v2706_v43, %v2705_v42  ;;  %4742 = vmatpush3.bf16.msra.mxu1 %v5684_v52  ;;  %v2383_v40 = vpop.f32.mrb[3].mxu1  ;;  %v2389_v42 = vadd.f32 %v4578_v63, %v5485_v30  ;;  %v2381_v43 = vadd.f32 %v5485_v30, %v2380_v50 }
 0x19e   : > { %v4743_v15 = vpack.c.bf16 %v2704_v14, %v2703_v44  ;;  %v4470_v48 = vpop.f32.mrb[88].mxu0  ;;  %v2392_v44 = vadd.f32 %v4579_v31, %v5485_v30 }
 0x19f   : > { %v1957_v49 = vadd.f32 %v4470_v48, %v5485_v30  ;;  %v1948_v53 = vpop.f32.mrb[89].mxu0 }
 0x1a0   : > { %v1949_v54 = vadd.f32 %v5485_v30, %v1948_v53  ;;  %v4471_v19 = vpop.f32.mrb[90].mxu0  ;;  %4744 = vmatprep.subr.bf16.mxu1 %v4743_v15  ;;  %v2384_v15 = vadd.f32 %v5485_v30, %v2383_v40  ;;  %v2817_v53 = vmax.f32 %v2389_v42, 0.0 }
 0x1a1   : > { %v1960_v57 = vadd.f32 %v4471_v19, %v5485_v30  ;;  %v1951_v12 = vpop.f32.mrb[91].mxu0  ;;  %4746 = vmatpush3.bf16.msra.mxu1 %v5702_v38  ;;  %v2709_v59 = vmax.f32 %v1957_v49, 0.0  ;;  %v2818_v19 = vmax.f32 %v2392_v44, 0.0 }
 0x1a2   : > { %v1952_v58 = vadd.f32 %v5485_v30, %v1951_v12  ;;  %4748 = vmatprep.subr.bf16.mxu1 %v4747_v47  ;;  %v2707_v52 = vmax.f32 %v1949_v54, 0.0  ;;  %v2815_v54 = vmax.f32 %v2381_v43, 0.0 }
 0x1a3   : > { %v2710_v60 = vmax.f32 %v1960_v57, 0.0 }
 0x1a4   : > { %v2708_v0 = vmax.f32 %v1952_v58, 0.0  ;;  %v2816_v58 = vmax.f32 %v2384_v15, 0.0 }
 0x1a5   : > { %v4755_v1 = vpack.c.bf16 %v2710_v60, %v2709_v59  ;;  %4750 = vmatpush3.bf16.msra.mxu1 %v5700_v61 }
 0x1a6   : > { %v4751_v2 = vpack.c.bf16 %v2708_v0, %v2707_v52  ;;  %v4474_v3 = vpop.f32.mrb[92].mxu0  ;;  %v5791_v52 = vpack.c.bf16 %v2818_v19, %v2817_v53 }
 0x1a7   : > { %v1973_v35 = vadd.f32 %v4474_v3, %v5485_v30  ;;  %v1964_v4 = vpop.f32.mrb[93].mxu0 }
 0x1a8   : > { %v1965_v5 = vadd.f32 %v5485_v30, %v1964_v4  ;;  %v4475_v6 = vpop.f32.mrb[94].mxu0  ;;  %4752 = vmatprep.subr.bf16.mxu1 %v4751_v2 }
 0x1a9   : > { %v1976_v38 = vadd.f32 %v4475_v6, %v5485_v30  ;;  %v1967_v7 = vpop.f32.mrb[95].mxu0  ;;  %4754 = vmatpush3.bf16.msra.mxu1 %v5714_v56  ;;  %v2713_v10 = vmax.f32 %v1973_v35, 0.0  ;;  %v2897_v56 = vsub.s32 4, %v5458_v20 }
 0x1aa   : > { %v1968_v9 = vadd.f32 %v5485_v30, %v1967_v7  ;;  %4756 = vmatprep.subr.bf16.mxu1 %v4755_v1  ;;  %v2711_v61 = vmax.f32 %v1965_v5, 0.0  ;;  %v5794_v1 = vpack.c.bf16 %v2816_v58, %v2815_v54 }
 0x1ab   : > { %v2714_v11 = vmax.f32 %v1976_v38, 0.0  ;;  %v2898_v34 = vrot.slane %v5766_v39, %v2897_v56 }
 0x1ac   : > { %v2712_v16 = vmax.f32 %v1968_v9, 0.0 }
 0x1ad   : > { %v4763_v17 = vpack.c.bf16 %v2714_v11, %v2713_v10  ;;  %4758 = vmatpush3.bf16.msra.mxu1 %v5712_v55 }
 0x1ae   : > { %v4759_v45 = vpack.c.bf16 %v2712_v16, %v2711_v61  ;;  %v4478_v18 = vpop.f32.mrb[96].mxu0 }
 0x1af   : > { %v1989_v23 = vadd.f32 %v4478_v18, %v5485_v30  ;;  %v1980_v24 = vpop.f32.mrb[97].mxu0 }
 0x1b0   : > { %v1981_v25 = vadd.f32 %v5485_v30, %v1980_v24  ;;  %v4479_v26 = vpop.f32.mrb[98].mxu0  ;;  %4760 = vmatprep.subr.bf16.mxu1 %v4759_v45 }
 0x1b1   : > { %v1992_v62 = vadd.f32 %v4479_v26, %v5485_v30  ;;  %v1983_v28 = vpop.f32.mrb[99].mxu0  ;;  %4762 = vmatpush3.bf16.msra.mxu1 %v5726_v46  ;;  %v2717_v22 = vmax.f32 %v1989_v23, 0.0  ;;  %v2910_v46 = vrot.slane %v5766_v39, %v6248_v27 }
 0x1b2   : > { %v1984_v55 = vadd.f32 %v5485_v30, %v1983_v28  ;;  %4764 = vmatprep.subr.bf16.mxu1 %v4763_v17  ;;  %v2715_v36 = vmax.f32 %v1981_v25, 0.0 }
 0x1b3   : > { %v2718_v29 = vmax.f32 %v1992_v62, 0.0 }
 0x1b4   : > { %v2716_v37 = vmax.f32 %v1984_v55, 0.0 }
 0x1b5   : > { %v5774_v41 = vpack.c.bf16 %v2718_v29, %v2717_v22  ;;  %4766 = vmatpush3.bf16.msra.mxu1 %v5724_v8  ;;  %v5787_v8 = vld [vmem:[%s6243_s3] ss:$0 sm:$0xff] }
 0x1b6   : > { %v5780_v14 = vpack.c.bf16 %v2716_v37, %v2715_v36  ;;  %v4482_v47 = vpop.f32.mrb[100].mxu0 }
 0x1b7   : > { %v2005_v48 = vadd.f32 %v4482_v47, %v5485_v30  ;;  %v1996_v49 = vpop.f32.mrb[101].mxu0  ;;  %v4582_v30 = vpop.f32.mrb[4].mxu1 }
 0x1b8   : > { %v1997_v57 = vadd.f32 %v5787_v8, %v1996_v49  ;;  %v4483_v12 = vpop.f32.mrb[102].mxu0  ;;  %3164 = vmatmul.mubr.f32.vlgmr.msra.gmra.mrb[64].mxu1 %v2898_v34  ;;  %v2396_v2 = vpop.f32.mrb[5].mxu1  ;;  %v2405_v9 = vadd.f32 %v5787_v8, %v4582_v30 }
 0x1b9   : > { %v2008_v59 = vadd.f32 %v5787_v8, %v4483_v12  ;;  %v1999_v60 = vpop.f32.mrb[103].mxu0  ;;  %3233 = vmatprep.mubr.f32.mxu1 %v2910_v46  ;;  %v2721_v3 = vmax.f32 %v2005_v48, 0.0  ;;  %v4583_v4 = vpop.f32.mrb[6].mxu1  ;;  %v2397_v10 = vadd.f32 %v5787_v8, %v2396_v2 }
 0x1ba   : > { %v2000_v0 = vadd.f32 %v5787_v8, %v1999_v60  ;;  %v2719_v5 = vmax.f32 %v1997_v57, 0.0  ;;  %v2399_v38 = vpop.f32.mrb[7].mxu1  ;;  %v2408_v11 = vadd.f32 %v5787_v8, %v4583_v4  ;;  %v2821_v23 = vmax.f32 %v2405_v9, 0.0 }
 0x1bb   : > { %v2722_v35 = vmax.f32 %v2008_v59, 0.0  ;;  %v2400_v17 = vadd.f32 %v5787_v8, %v2399_v38  ;;  %v2819_v24 = vmax.f32 %v2397_v10, 0.0  ;;  %v4586_v22 = vpop.f32.mrb[8].mxu1 }
 0x1bc   : > { %v2720_v6 = vmax.f32 %v2000_v0, 0.0  ;;  %v2822_v25 = vmax.f32 %v2408_v11, 0.0  ;;  %v2412_v36 = vpop.f32.mrb[9].mxu1  ;;  %v2421_v47 = vadd.f32 %v5787_v8, %v4586_v22 }
 0x1bd   : > { %v5796_v7 = vpack.c.bf16 %v2722_v35, %v2721_v3  ;;  %v2820_v28 = vmax.f32 %v2400_v17, 0.0  ;;  %v4587_v46 = vpop.f32.mrb[10].mxu1  ;;  %v2413_v15 = vadd.f32 %v5787_v8, %v2412_v36 }
 0x1be   : > { %v5801_v61 = vpack.c.bf16 %v2720_v6, %v2719_v5  ;;  %v4486_v16 = vpop.f32.mrb[104].mxu0  ;;  %v5807_v50 = vpack.c.bf16 %v2822_v25, %v2821_v23  ;;  %v2415_v43 = vpop.f32.mrb[11].mxu1  ;;  %v2424_v48 = vadd.f32 %v5787_v8, %v4587_v46  ;;  %v2825_v12 = vmax.f32 %v2421_v47, 0.0 }
 0x1bf   : > { %v2021_v45 = vadd.f32 %v5787_v8, %v4486_v16  ;;  %v2012_v18 = vpop.f32.mrb[105].mxu0  ;;  %v5810_v31 = vpack.c.bf16 %v2820_v28, %v2819_v24  ;;  %v2416_v54 = vadd.f32 %v5787_v8, %v2415_v43  ;;  %v2823_v58 = vmax.f32 %v2413_v15, 0.0  ;;  %v4590_v4 = vpop.f32.mrb[12].mxu1 }
 0x1c0   : > { %v2013_v26 = vadd.f32 %v5787_v8, %v2012_v18  ;;  %v4487_v62 = vpop.f32.mrb[106].mxu0  ;;  %v2826_v59 = vmax.f32 %v2424_v48, 0.0  ;;  %v2428_v38 = vpop.f32.mrb[13].mxu1  ;;  %v2437_v23 = vadd.f32 %v5787_v8, %v4590_v4 }
 0x1c1   : > { %v2024_v63 = vadd.f32 %v5787_v8, %v4487_v62  ;;  %v2015_v55 = vpop.f32.mrb[107].mxu0  ;;  %v2725_v37 = vmax.f32 %v2021_v45, 0.0  ;;  %v2824_v0 = vmax.f32 %v2416_v54, 0.0  ;;  %v4591_v11 = vpop.f32.mrb[14].mxu1  ;;  %v2429_v24 = vadd.f32 %v5787_v8, %v2428_v38 }
 0x1c2   : > { %v2016_v29 = vadd.f32 %v5787_v8, %v2015_v55  ;;  %v2723_v40 = vmax.f32 %v2013_v26, 0.0  ;;  %v5823_v35 = vpack.c.bf16 %v2826_v59, %v2825_v12  ;;  %v2431_v45 = vpop.f32.mrb[15].mxu1  ;;  %v2440_v25 = vadd.f32 %v5787_v8, %v4591_v11 }
 0x1c3   : > { %v2726_v34 = vmax.f32 %v2024_v63, 0.0  ;;  %v5826_v6 = vpack.c.bf16 %v2824_v0, %v2823_v58  ;;  %v2432_v28 = vadd.f32 %v5787_v8, %v2431_v45  ;;  %v2829_v22 = vmax.f32 %v2437_v23, 0.0  ;;  %v4594_v47 = vpop.f32.mrb[16].mxu1 }
 0x1c4   : > { %v2724_v42 = vmax.f32 %v2016_v29, 0.0  ;;  %v2827_v29 = vmax.f32 %v2429_v24, 0.0  ;;  %v2830_v36 = vmax.f32 %v2440_v25, 0.0 }
 0x1c5   : > { %v5812_v44 = vpack.c.bf16 %v2726_v34, %v2725_v37  ;;  %v2828_v46 = vmax.f32 %v2432_v28, 0.0 }
 0x1c6   : > { %v5817_v49 = vpack.c.bf16 %v2724_v42, %v2723_v40  ;;  %v4490_v53 = vpop.f32.mrb[108].mxu0  ;;  %v5839_v43 = vpack.c.bf16 %v2830_v36, %v2829_v22 }
 0x1c7   : > { %v2037_v19 = vadd.f32 %v5787_v8, %v4490_v53  ;;  %v2028_v57 = vpop.f32.mrb[109].mxu0  ;;  %v5842_v48 = vpack.c.bf16 %v2828_v46, %v2827_v29  ;;  %v2444_v53 = vpop.f32.mrb[17].mxu1 }
 0x1c8   : > { %v2029_v60 = vadd.f32 %v5787_v8, %v2028_v57  ;;  %v4491_v30 = vpop.f32.mrb[110].mxu0  ;;  %v4595_v57 = vpop.f32.mrb[18].mxu1  ;;  %v2445_v0 = vadd.f32 %v5787_v8, %v2444_v53 }
 0x1c9   : > { %v2040_v2 = vadd.f32 %v5787_v8, %v4491_v30  ;;  %v2031_v3 = vpop.f32.mrb[111].mxu0  ;;  %v2729_v9 = vmax.f32 %v2037_v19, 0.0  ;;  %v2447_v59 = vpop.f32.mrb[19].mxu1  ;;  %v2453_v30 = vadd.f32 %v5787_v8, %v4594_v47 }
 0x1ca   : > { %v2032_v5 = vadd.f32 %v5787_v8, %v2031_v3  ;;  %v2727_v16 = vmax.f32 %v2029_v60, 0.0  ;;  %v2831_v11 = vmax.f32 %v2445_v0, 0.0  ;;  %v4598_v28 = vpop.f32.mrb[20].mxu1 }
 0x1cb   : > { %v2730_v10 = vmax.f32 %v2040_v2, 0.0  ;;  %v2456_v2 = vadd.f32 %v5787_v8, %v4595_v57  ;;  %v2460_v22 = vpop.f32.mrb[21].mxu1 }
 0x1cc   : > { %v2728_v17 = vmax.f32 %v2032_v5, 0.0  ;;  %v2448_v5 = vadd.f32 %v5787_v8, %v2447_v59  ;;  %v2461_v47 = vadd.f32 %v5787_v8, %v2460_v22 }
 0x1cd   : > { %v5828_v18 = vpack.c.bf16 %v2730_v10, %v2729_v9  ;;  %v2833_v10 = vmax.f32 %v2453_v30, 0.0 }
 0x1ce   : > { %v5833_v26 = vpack.c.bf16 %v2728_v17, %v2727_v16  ;;  %v4494_v62 = vpop.f32.mrb[112].mxu0  ;;  %v2834_v16 = vmax.f32 %v2456_v2, 0.0  ;;  %v2832_v23 = vmax.f32 %v2448_v5, 0.0  ;;  %v2835_v59 = vmax.f32 %v2461_v47, 0.0 }
 0x1cf   : > { %v2053_v63 = vadd.f32 %v5787_v8, %v4494_v62  ;;  %v2044_v55 = vpop.f32.mrb[113].mxu0 }
 0x1d0   : > { %v2045_v37 = vadd.f32 %v5787_v8, %v2044_v55  ;;  %v4495_v34 = vpop.f32.mrb[114].mxu0  ;;  %v5852_v62 = vpack.c.bf16 %v2834_v16, %v2833_v10  ;;  %v5855_v55 = vpack.c.bf16 %v2832_v23, %v2831_v11 }
 0x1d1   : > { %v2056_v40 = vadd.f32 %v5787_v8, %v4495_v34  ;;  %v2047_v42 = vpop.f32.mrb[115].mxu0  ;;  %v2733_v54 = vmax.f32 %v2053_v63, 0.0 }
 0x1d2   : > { %v2048_v15 = vadd.f32 %v5787_v8, %v2047_v42  ;;  %v2731_v12 = vmax.f32 %v2045_v37, 0.0  ;;  %v4599_v37 = vpop.f32.mrb[22].mxu1 }
 0x1d3   : > { %v2734_v19 = vmax.f32 %v2056_v40, 0.0  ;;  %v2463_v40 = vpop.f32.mrb[23].mxu1 }
 0x1d4   : > { %v2732_v58 = vmax.f32 %v2048_v15, 0.0  ;;  %v2472_v15 = vadd.f32 %v5787_v8, %v4599_v37  ;;  %v4602_v5 = vpop.f32.mrb[24].mxu1 }
 0x1d5   : > { %v4771_v60 = vpack.c.bf16 %v2734_v19, %v2733_v54  ;;  %v2464_v19 = vadd.f32 %v5787_v8, %v2463_v40  ;;  %v2476_v10 = vpop.f32.mrb[25].mxu1 }
 0x1d6   : > { %v4767_v3 = vpack.c.bf16 %v2732_v58, %v2731_v12  ;;  %v4498_v4 = vpop.f32.mrb[116].mxu0 }
 0x1d7   : > { %v2069_v38 = vadd.f32 %v5787_v8, %v4498_v4  ;;  %v2060_v9 = vpop.f32.mrb[117].mxu0 }
 0x1d8   : > { %v2061_v17 = vadd.f32 %v5787_v8, %v2060_v9  ;;  %v4499_v45 = vpop.f32.mrb[118].mxu0  ;;  %4768 = vmatprep.subr.bf16.mxu1 %v4767_v3 }
 0x1d9   : > { %v2072_v24 = vadd.f32 %v5787_v8, %v4499_v45  ;;  %v2063_v25 = vpop.f32.mrb[119].mxu0  ;;  %4770 = vmatpush3.bf16.msra.mxu1 %v5780_v14  ;;  %v2737_v29 = vmax.f32 %v2069_v38, 0.0  ;;  %v2469_v14 = vadd.f32 %v5787_v8, %v4598_v28  ;;  %v2477_v28 = vadd.f32 %v5787_v8, %v2476_v10 }
 0x1da   : > { %v2064_v63 = vadd.f32 %v5787_v8, %v2063_v25  ;;  %4772 = vmatprep.subr.bf16.mxu1 %v4771_v60  ;;  %v2735_v34 = vmax.f32 %v2061_v17, 0.0  ;;  %v2838_v60 = vmax.f32 %v2472_v15, 0.0  ;;  %v4603_v17 = vpop.f32.mrb[26].mxu1 }
 0x1db   : > { %v2738_v36 = vmax.f32 %v2072_v24, 0.0  ;;  %v2837_v58 = vmax.f32 %v2469_v14, 0.0  ;;  %v2479_v24 = vpop.f32.mrb[27].mxu1  ;;  %v2839_v40 = vmax.f32 %v2477_v28, 0.0 }
 0x1dc   : > { %v2736_v46 = vmax.f32 %v2064_v63, 0.0  ;;  %v2488_v63 = vadd.f32 %v5787_v8, %v4603_v17 }
 0x1dd   : > { %v4779_v42 = vpack.c.bf16 %v2738_v36, %v2737_v29  ;;  %4774 = vmatpush3.bf16.msra.mxu1 %v5774_v41  ;;  %v2836_v41 = vmax.f32 %v2464_v19, 0.0  ;;  %v5866_v4 = vpack.c.bf16 %v2838_v60, %v2837_v58  ;;  %v2480_v36 = vadd.f32 %v5787_v8, %v2479_v24  ;;  %v4606_v19 = vpop.f32.mrb[28].mxu1 }
 0x1de   : > { %v4775_v53 = vpack.c.bf16 %v2736_v46, %v2735_v34  ;;  %v4502_v54 = vpop.f32.mrb[120].mxu0  ;;  %v2492_v58 = vpop.f32.mrb[29].mxu1 }
 0x1df   : > { %v2085_v57 = vadd.f32 %v5787_v8, %v4502_v54  ;;  %v2076_v12 = vpop.f32.mrb[121].mxu0  ;;  %v5869_v9 = vpack.c.bf16 %v2836_v41, %v2835_v59 }
 0x1e0   : > { %v2077_v30 = vadd.f32 %v5787_v8, %v2076_v12  ;;  %v4503_v0 = vpop.f32.mrb[122].mxu0  ;;  %4776 = vmatprep.subr.bf16.mxu1 %v4775_v53 }
 0x1e1   : > { %v2088_v2 = vadd.f32 %v5787_v8, %v4503_v0  ;;  %v2079_v3 = vpop.f32.mrb[123].mxu0  ;;  %4778 = vmatpush3.bf16.msra.mxu1 %v5801_v61  ;;  %v2741_v11 = vmax.f32 %v2085_v57, 0.0  ;;  %v2485_v61 = vadd.f32 %v5787_v8, %v4602_v5  ;;  %v2493_v5 = vadd.f32 %v5787_v8, %v2492_v58 }
 0x1e2   : > { %v2080_v38 = vadd.f32 %v5787_v8, %v2079_v3  ;;  %4780 = vmatprep.subr.bf16.mxu1 %v4779_v42  ;;  %v2739_v45 = vmax.f32 %v2077_v30, 0.0  ;;  %v2842_v42 = vmax.f32 %v2488_v63, 0.0  ;;  %v4607_v30 = vpop.f32.mrb[30].mxu1 }
 0x1e3   : > { %v2742_v16 = vmax.f32 %v2088_v2, 0.0  ;;  %v2841_v46 = vmax.f32 %v2485_v61, 0.0  ;;  %v2495_v2 = vpop.f32.mrb[31].mxu1  ;;  %v2843_v24 = vmax.f32 %v2493_v5, 0.0 }
 0x1e4   : > { %v2740_v23 = vmax.f32 %v2080_v38, 0.0  ;;  %v2504_v38 = vadd.f32 %v5787_v8, %v4607_v30 }
 0x1e5   : > { %v4787_v25 = vpack.c.bf16 %v2742_v16, %v2741_v11  ;;  %4782 = vmatpush3.bf16.msra.mxu1 %v5796_v7  ;;  %v2840_v7 = vmax.f32 %v2480_v36, 0.0  ;;  %v5880_v54 = vpack.c.bf16 %v2842_v42, %v2841_v46  ;;  %v2496_v16 = vadd.f32 %v5787_v8, %v2495_v2  ;;  %v5898_v36 = vld [vmem:[%s6241_s1 + $0x8] sm:$0xff] }
 0x1e6   : > { %v4783_v22 = vpack.c.bf16 %v2740_v23, %v2739_v45  ;;  %v4506_v29 = vpop.f32.mrb[124].mxu0 }
 0x1e7   : > { %v2101_v37 = vadd.f32 %v5787_v8, %v4506_v29  ;;  %v2092_v34 = vpop.f32.mrb[125].mxu0  ;;  %v5883_v12 = vpack.c.bf16 %v2840_v7, %v2839_v40  ;;  %v2844_v63 = vmax.f32 %v2496_v16, 0.0 }
 0x1e8   : > { %v2093_v14 = vadd.f32 %v5787_v8, %v2092_v34  ;;  %v4507_v47 = vpop.f32.mrb[126].mxu0  ;;  %4784 = vmatprep.subr.bf16.mxu1 %v4783_v22  ;;  %v4610_v34 = vpop.f32.mrb[32].mxu1 }
 0x1e9   : > { %v2104_v15 = vadd.f32 %v5787_v8, %v4507_v47  ;;  %v2095_v53 = vpop.f32.mrb[127].mxu0  ;;  %4786 = vmatpush3.bf16.msra.mxu1 %v5817_v49  ;;  %v2745_v59 = vmax.f32 %v2101_v37, 0.0  ;;  %v2501_v49 = vadd.f32 %v5787_v8, %v4606_v19  ;;  %v5903_v40 = vpack.c.bf16 %v2844_v63, %v2843_v24  ;;  %v2508_v42 = vpop.f32.mrb[33].mxu1 }
 0x1ea   : > { %v2096_v57 = vadd.f32 %v5787_v8, %v2095_v53  ;;  %4788 = vmatprep.subr.bf16.mxu1 %v4787_v25  ;;  %v2743_v0 = vmax.f32 %v2093_v14, 0.0  ;;  %v2846_v25 = vmax.f32 %v2504_v38, 0.0  ;;  %v4611_v7 = vpop.f32.mrb[34].mxu1  ;;  %v2918_v19 = vrot.slane %v5898_v36, %v2885_v21 }
 0x1eb   : > { %v2746_v60 = vmax.f32 %v2104_v15, 0.0  ;;  %v2845_v23 = vmax.f32 %v2501_v49, 0.0  ;;  %v2520_v30 = vadd.f32 %v5787_v8, %v4611_v7 }
 0x1ec   : > { %v2744_v41 = vmax.f32 %v2096_v57, 0.0  ;;  %v2511_v57 = vpop.f32.mrb[35].mxu1 }
 0x1ed   : > { %v4795_v3 = vpack.c.bf16 %v2746_v60, %v2745_v59  ;;  %4790 = vmatpush3.bf16.msra.mxu1 %v5812_v44  ;;  %v6247_v44 = vsub.s32 6, %v5458_v20  ;;  %v5900_v37 = vpack.c.bf16 %v2846_v25, %v2845_v23  ;;  %v2517_v59 = vadd.f32 %v5787_v8, %v4610_v34 }
 0x1ee   : > { %v4791_v10 = vpack.c.bf16 %v2744_v41, %v2743_v0  ;;  %v4510_v11 = vpop.f32.mrb[128].mxu0  ;;  %v2509_v60 = vadd.f32 %v5787_v8, %v2508_v42  ;;  %v2850_v5 = vmax.f32 %v2520_v30, 0.0 }
 0x1ef   : > { %v2117_v17 = vadd.f32 %v5787_v8, %v4510_v11  ;;  %v2108_v45 = vpop.f32.mrb[129].mxu0  ;;  %v2849_v21 = vmax.f32 %v2517_v59, 0.0  ;;  %v4614_v11 = vpop.f32.mrb[36].mxu1 }
 0x1f0   : > { %v2109_v61 = vadd.f32 %v5787_v8, %v2108_v45  ;;  %v4511_v28 = vpop.f32.mrb[130].mxu0  ;;  %4792 = vmatprep.subr.bf16.mxu1 %v4791_v10  ;;  %v2847_v49 = vmax.f32 %v2509_v60, 0.0  ;;  %v2533_v23 = vadd.f32 %v5787_v8, %v4614_v11  ;;  %v2524_v24 = vpop.f32.mrb[37].mxu1 }
 0x1f1   : > { %v2120_v22 = vadd.f32 %v5787_v8, %v4511_v28  ;;  %v2111_v29 = vpop.f32.mrb[131].mxu0  ;;  %4794 = vmatpush3.bf16.msra.mxu1 %v5833_v26  ;;  %v2749_v14 = vmax.f32 %v2117_v17, 0.0  ;;  %v2906_v26 = vrot.slane %v5766_v39, %v6247_v44  ;;  %v2512_v39 = vadd.f32 %v5787_v8, %v2511_v57  ;;  %v4615_v63 = vpop.f32.mrb[38].mxu1 }
 0x1f2   : > { %v2112_v46 = vadd.f32 %v5787_v8, %v2111_v29  ;;  %4796 = vmatprep.subr.bf16.mxu1 %v4795_v3  ;;  %v2747_v15 = vmax.f32 %v2109_v61, 0.0  ;;  %v5923_v45 = vpack.c.bf16 %v2850_v5, %v2849_v21  ;;  %v2525_v28 = vadd.f32 %v5787_v8, %v2524_v24  ;;  %v2527_v42 = vpop.f32.mrb[39].mxu1 }
 0x1f3   : > { %v2750_v47 = vmax.f32 %v2120_v22, 0.0  ;;  %v2848_v10 = vmax.f32 %v2512_v39, 0.0  ;;  %v2853_v34 = vmax.f32 %v2533_v23, 0.0  ;;  %v4618_v60 = vpop.f32.mrb[40].mxu1 }
 0x1f4   : > { %v2748_v53 = vmax.f32 %v2112_v46, 0.0  ;;  %v2536_v46 = vadd.f32 %v5787_v8, %v4615_v63  ;;  %v2851_v7 = vmax.f32 %v2525_v28, 0.0 }
 0x1f5   : > { %v5911_v58 = vpack.c.bf16 %v2750_v47, %v2749_v14  ;;  %4798 = vmatpush3.bf16.msra.mxu1 %v5828_v18  ;;  %v5927_v61 = vpack.c.bf16 %v2848_v10, %v2847_v49 }
 0x1f6   : > { %v5917_v0 = vpack.c.bf16 %v2748_v53, %v2747_v15  ;;  %v4514_v41 = vpop.f32.mrb[132].mxu0  ;;  %v2528_v15 = vadd.f32 %v5787_v8, %v2527_v42 }
 0x1f7   : > { %v2133_v2 = vadd.f32 %v5787_v8, %v4514_v41  ;;  %v2124_v3 = vpop.f32.mrb[133].mxu0 }
 0x1f8   : > { %v2125_v38 = vadd.f32 %v5787_v8, %v2124_v3  ;;  %v4515_v18 = vpop.f32.mrb[134].mxu0  ;;  %3234 = vmatmul.mubr.f32.vlgmr.msra.gmra.mrb[66].mxu1 %v2906_v26  ;;  %v2854_v26 = vmax.f32 %v2536_v46, 0.0  ;;  %v2852_v59 = vmax.f32 %v2528_v15, 0.0 }
 0x1f9   : > { %v2136_v16 = vadd.f32 %v5787_v8, %v4515_v18  ;;  %v2127_v17 = vpop.f32.mrb[135].mxu0  ;;  %3303 = vmatprep.mubr.f32.mxu1 %v2918_v19  ;;  %v2753_v22 = vmax.f32 %v2133_v2, 0.0  ;;  %v2549_v2 = vadd.f32 %v5787_v8, %v4618_v60  ;;  %v2540_v18 = vpop.f32.mrb[41].mxu1 }
 0x1fa   : > { %v2128_v25 = vadd.f32 %v5787_v8, %v2127_v17  ;;  %v2751_v14 = vmax.f32 %v2125_v38, 0.0  ;;  %v5937_v39 = vpack.c.bf16 %v2854_v26, %v2853_v34  ;;  %v5941_v49 = vpack.c.bf16 %v2852_v59, %v2851_v7 }
 0x1fb   : > { %v2754_v29 = vmax.f32 %v2136_v16, 0.0  ;;  %v2541_v11 = vadd.f32 %v5787_v8, %v2540_v18  ;;  %v4619_v16 = vpop.f32.mrb[42].mxu1  ;;  %v2857_v24 = vmax.f32 %v2549_v2, 0.0 }
 0x1fc   : > { %v2752_v47 = vmax.f32 %v2128_v25, 0.0  ;;  %v2552_v25 = vadd.f32 %v5787_v8, %v4619_v16  ;;  %v2543_v28 = vpop.f32.mrb[43].mxu1 }
 0x1fd   : > { %v5932_v53 = vpack.c.bf16 %v2754_v29, %v2753_v22  ;;  %v2855_v29 = vmax.f32 %v2541_v11, 0.0  ;;  %v2544_v34 = vadd.f32 %v5787_v8, %v2543_v28  ;;  %v4622_v15 = vpop.f32.mrb[44].mxu1 }
 0x1fe   : > { %v5934_v19 = vpack.c.bf16 %v2752_v47, %v2751_v14  ;;  %v4518_v57 = vpop.f32.mrb[136].mxu0  ;;  %v2858_v42 = vmax.f32 %v2552_v25, 0.0  ;;  %v2565_v60 = vadd.f32 %v5787_v8, %v4622_v15 }
 0x1ff   : > { %v2149_v30 = vadd.f32 %v5787_v8, %v4518_v57  ;;  %v2140_v41 = vpop.f32.mrb[137].mxu0  ;;  %v2856_v7 = vmax.f32 %v2544_v34, 0.0 }
 0x200   : > { %v2141_v3 = vadd.f32 %v5787_v8, %v2140_v41  ;;  %v4519_v21 = vpop.f32.mrb[138].mxu0  ;;  %v5953_v59 = vpack.c.bf16 %v2858_v42, %v2857_v24 }
 0x201   : > { %v2152_v5 = vadd.f32 %v5787_v8, %v4519_v21  ;;  %v2143_v38 = vpop.f32.mrb[139].mxu0  ;;  %v2757_v17 = vmax.f32 %v2149_v30, 0.0  ;;  %v5957_v2 = vpack.c.bf16 %v2856_v7, %v2855_v29 }
 0x202   : > { %v2144_v10 = vadd.f32 %v5787_v8, %v2143_v38  ;;  %v2755_v63 = vmax.f32 %v2141_v3, 0.0 }
 0x203   : > { %v2758_v23 = vmax.f32 %v2152_v5, 0.0  ;;  %v2556_v5 = vpop.f32.mrb[45].mxu1 }
 0x204   : > { %v2756_v22 = vmax.f32 %v2144_v10, 0.0  ;;  %v2557_v18 = vadd.f32 %v5787_v8, %v2556_v5  ;;  %v4623_v10 = vpop.f32.mrb[46].mxu1 }
 0x205   : > { %v5948_v46 = vpack.c.bf16 %v2758_v23, %v2757_v17  ;;  %v2861_v17 = vmax.f32 %v2565_v60, 0.0  ;;  %v2568_v23 = vadd.f32 %v5787_v8, %v4623_v10  ;;  %v2559_v24 = vpop.f32.mrb[47].mxu1 }
 0x206   : > { %v5950_v14 = vpack.c.bf16 %v2756_v22, %v2755_v63  ;;  %v4522_v47 = vpop.f32.mrb[140].mxu0  ;;  %v2859_v63 = vmax.f32 %v2557_v18, 0.0  ;;  %v2560_v22 = vadd.f32 %v5787_v8, %v2559_v24  ;;  %v4626_v15 = vpop.f32.mrb[48].mxu1 }
 0x207   : > { %v2165_v26 = vadd.f32 %v5787_v8, %v4522_v47  ;;  %v2156_v57 = vpop.f32.mrb[141].mxu0  ;;  %v2862_v34 = vmax.f32 %v2568_v23, 0.0  ;;  %v2572_v18 = vpop.f32.mrb[49].mxu1 }
 0x208   : > { %v2157_v30 = vadd.f32 %v5787_v8, %v2156_v57  ;;  %v4523_v41 = vpop.f32.mrb[142].mxu0  ;;  %v2860_v7 = vmax.f32 %v2560_v22, 0.0 }
 0x209   : > { %v2168_v3 = vadd.f32 %v5787_v8, %v4523_v41  ;;  %v2159_v21 = vpop.f32.mrb[143].mxu0  ;;  %v2761_v11 = vmax.f32 %v2165_v26, 0.0  ;;  %v5969_v60 = vpack.c.bf16 %v2862_v34, %v2861_v17  ;;  %v2581_v41 = vadd.f32 %v5787_v8, %v4626_v15 }
 0x20a   : > { %v2160_v38 = vadd.f32 %v5787_v8, %v2159_v21  ;;  %v2759_v25 = vmax.f32 %v2157_v30, 0.0  ;;  %v5973_v21 = vpack.c.bf16 %v2860_v7, %v2859_v63 }
 0x20b   : > { %v2762_v16 = vmax.f32 %v2168_v3, 0.0  ;;  %v2865_v17 = vmax.f32 %v2581_v41, 0.0 }
 0x20c   : > { %v2760_v28 = vmax.f32 %v2160_v38, 0.0 }
 0x20d   : > { %v5964_v29 = vpack.c.bf16 %v2762_v16, %v2761_v11  ;;  %v2573_v11 = vadd.f32 %v5787_v8, %v2572_v18  ;;  %v4627_v16 = vpop.f32.mrb[50].mxu1 }
 0x20e   : > { %v5966_v42 = vpack.c.bf16 %v2760_v28, %v2759_v25  ;;  %v4526_v47 = vpop.f32.mrb[144].mxu0  ;;  %v2584_v25 = vadd.f32 %v5787_v8, %v4627_v16  ;;  %v2575_v28 = vpop.f32.mrb[51].mxu1 }
 0x20f   : > { %v2181_v26 = vadd.f32 %v5787_v8, %v4526_v47  ;;  %v2172_v57 = vpop.f32.mrb[145].mxu0  ;;  %v2863_v47 = vmax.f32 %v2573_v11, 0.0  ;;  %v2576_v63 = vadd.f32 %v5787_v8, %v2575_v28 }
 0x210   : > { %v2173_v30 = vadd.f32 %v5787_v8, %v2172_v57  ;;  %v4527_v3 = vpop.f32.mrb[146].mxu0  ;;  %v2866_v15 = vmax.f32 %v2584_v25, 0.0 }
 0x211   : > { %v2184_v5 = vadd.f32 %v5787_v8, %v4527_v3  ;;  %v2175_v38 = vpop.f32.mrb[147].mxu0  ;;  %v2765_v23 = vmax.f32 %v2181_v26, 0.0  ;;  %v2864_v44 = vmax.f32 %v2576_v63, 0.0 }
 0x212   : > { %v2176_v10 = vadd.f32 %v5787_v8, %v2175_v38  ;;  %v2763_v22 = vmax.f32 %v2173_v30, 0.0  ;;  %v5981_v27 = vpack.c.bf16 %v2866_v15, %v2865_v17  ;;  %v4630_v30 = vpop.f32.mrb[52].mxu1 }
 0x213   : > { %v2766_v24 = vmax.f32 %v2184_v5, 0.0  ;;  %v5984_v5 = vpack.c.bf16 %v2864_v44, %v2863_v47  ;;  %v2597_v16 = vadd.f32 %v5787_v8, %v4630_v30 }
 0x214   : > { %v2764_v34 = vmax.f32 %v2176_v10, 0.0 }
 0x215   : > { %v4803_v7 = vpack.c.bf16 %v2766_v24, %v2765_v23  ;;  %v2588_v23 = vpop.f32.mrb[53].mxu1 }
 0x216   : > { %v4799_v57 = vpack.c.bf16 %v2764_v34, %v2763_v22  ;;  %v4530_v3 = vpop.f32.mrb[148].mxu0  ;;  %v2589_v17 = vadd.f32 %v5787_v8, %v2588_v23  ;;  %v4631_v25 = vpop.f32.mrb[54].mxu1  ;;  %v2869_v34 = vmax.f32 %v2597_v16, 0.0 }
 0x217   : > { %v2197_v38 = vadd.f32 %v5787_v8, %v4530_v3  ;;  %v2188_v18 = vpop.f32.mrb[149].mxu0  ;;  %v2600_v44 = vadd.f32 %v5787_v8, %v4631_v25  ;;  %v2591_v47 = vpop.f32.mrb[55].mxu1 }
 0x218   : > { %v2189_v26 = vadd.f32 %v5787_v8, %v2188_v18  ;;  %v4531_v41 = vpop.f32.mrb[150].mxu0  ;;  %4800 = vmatprep.subr.bf16.mxu1 %v4799_v57  ;;  %v2867_v57 = vmax.f32 %v2589_v17, 0.0 }
 0x219   : > { %v2200_v10 = vadd.f32 %v5787_v8, %v4531_v41  ;;  %v2191_v11 = vpop.f32.mrb[151].mxu0  ;;  %4802 = vmatpush3.bf16.msra.mxu1 %v5917_v0  ;;  %v2769_v28 = vmax.f32 %v2197_v38, 0.0  ;;  %v2592_v0 = vadd.f32 %v5787_v8, %v2591_v47  ;;  %v2870_v18 = vmax.f32 %v2600_v44, 0.0 }
 0x21a   : > { %v2192_v24 = vadd.f32 %v5787_v8, %v2191_v11  ;;  %4804 = vmatprep.subr.bf16.mxu1 %v4803_v7  ;;  %v2767_v63 = vmax.f32 %v2189_v26, 0.0  ;;  %v4634_v11 = vpop.f32.mrb[56].mxu1 }
 0x21b   : > { %v2770_v22 = vmax.f32 %v2200_v10, 0.0  ;;  %v2868_v30 = vmax.f32 %v2592_v0, 0.0  ;;  %v5995_v16 = vpack.c.bf16 %v2870_v18, %v2869_v34  ;;  %v2613_v23 = vadd.f32 %v5787_v8, %v4634_v11 }
 0x21c   : > { %v2768_v15 = vmax.f32 %v2192_v24, 0.0 }
 0x21d   : > { %v4811_v3 = vpack.c.bf16 %v2770_v22, %v2769_v28  ;;  %4806 = vmatpush3.bf16.msra.mxu1 %v5911_v58  ;;  %v5999_v17 = vpack.c.bf16 %v2868_v30, %v2867_v57  ;;  %v2604_v28 = vpop.f32.mrb[57].mxu1 }
 0x21e   : > { %v4807_v41 = vpack.c.bf16 %v2768_v15, %v2767_v63  ;;  %v4534_v7 = vpop.f32.mrb[152].mxu0  ;;  %v2605_v34 = vadd.f32 %v5787_v8, %v2604_v28  ;;  %v4635_v44 = vpop.f32.mrb[58].mxu1  ;;  %v2873_v15 = vmax.f32 %v2613_v23, 0.0 }
 0x21f   : > { %v2213_v38 = vadd.f32 %v5787_v8, %v4534_v7  ;;  %v2204_v10 = vpop.f32.mrb[153].mxu0  ;;  %v2616_v0 = vadd.f32 %v5787_v8, %v4635_v44  ;;  %v2607_v18 = vpop.f32.mrb[59].mxu1 }
 0x220   : > { %v2205_v26 = vadd.f32 %v5787_v8, %v2204_v10  ;;  %v4535_v24 = vpop.f32.mrb[154].mxu0  ;;  %4808 = vmatprep.subr.bf16.mxu1 %v4807_v41  ;;  %v2871_v7 = vmax.f32 %v2605_v34, 0.0  ;;  %v2608_v30 = vadd.f32 %v5787_v8, %v2607_v18 }
 0x221   : > { %v2216_v58 = vadd.f32 %v5787_v8, %v4535_v24  ;;  %v2207_v25 = vpop.f32.mrb[155].mxu0  ;;  %4810 = vmatpush3.bf16.msra.mxu1 %v5934_v19  ;;  %v2773_v47 = vmax.f32 %v2213_v38, 0.0  ;;  %v2874_v19 = vmax.f32 %v2616_v0, 0.0 }
 0x222   : > { %v2208_v22 = vadd.f32 %v5787_v8, %v2207_v25  ;;  %4812 = vmatprep.subr.bf16.mxu1 %v4811_v3  ;;  %v2771_v57 = vmax.f32 %v2205_v26, 0.0  ;;  %v2872_v24 = vmax.f32 %v2608_v30, 0.0  ;;  %v4109_v25 = vpop.f32.mrb[60].mxu1 }
 0x223   : > { %v2774_v63 = vmax.f32 %v2216_v58, 0.0  ;;  %v6009_v23 = vpack.c.bf16 %v2874_v19, %v2873_v15 }
 0x224   : > { %v2772_v41 = vmax.f32 %v2208_v22, 0.0  ;;  %v6012_v22 = vpack.c.bf16 %v2872_v24, %v2871_v7 }
 0x225   : > { %v4819_v11 = vpack.c.bf16 %v2774_v63, %v2773_v47  ;;  %4814 = vmatpush3.bf16.msra.mxu1 %v5932_v53  ;;  %v4110_v53 = vpop.f32.mrb[61].mxu1 }
 0x226   : > { %v4815_v10 = vpack.c.bf16 %v2772_v41, %v2771_v57  ;;  %v4538_v3 = vpop.f32.mrb[156].mxu0  ;;  %v6017_v63 = vadd.f32 %v4110_v53, %v4109_v25 }
 0x227   : > { %v2229_v38 = vadd.f32 %v5787_v8, %v4538_v3  ;;  %v2220_v58 = vpop.f32.mrb[157].mxu0 }
 0x228   : > { %v2221_v28 = vadd.f32 %v5787_v8, %v2220_v58  ;;  %v4539_v26 = vpop.f32.mrb[158].mxu0  ;;  %4816 = vmatprep.subr.bf16.mxu1 %v4815_v10 }
 0x229   : > { %v2232_v34 = vadd.f32 %v5787_v8, %v4539_v26  ;;  %v2223_v44 = vpop.f32.mrb[159].mxu0  ;;  %4818 = vmatpush3.bf16.msra.mxu1 %v5950_v14  ;;  %v2777_v0 = vmax.f32 %v2229_v38, 0.0  ;;  %v2914_v26 = vrot.slane %v5898_v36, %v2881_v51 }
 0x22a   : > { %v2224_v47 = vadd.f32 %v5787_v8, %v2223_v44  ;;  %4820 = vmatprep.subr.bf16.mxu1 %v4819_v11  ;;  %v2775_v18 = vmax.f32 %v2221_v28, 0.0  ;;  %v2926_v44 = vrot.slane %v5898_v36, %v2893_v13 }
 0x22b   : > { %v2778_v15 = vmax.f32 %v2232_v34, 0.0 }
 0x22c   : > { %v2776_v57 = vmax.f32 %v2224_v47, 0.0 }
 0x22d   : > { %v4827_v41 = vpack.c.bf16 %v2778_v15, %v2777_v0  ;;  %4822 = vmatpush3.bf16.msra.mxu1 %v5948_v46 }
 0x22e   : > { %v4823_v7 = vpack.c.bf16 %v2776_v57, %v2775_v18  ;;  %v4542_v30 = vpop.f32.mrb[160].mxu0 }
 0x22f   : > { %v2245_v19 = vadd.f32 %v5787_v8, %v4542_v30  ;;  %v2236_v10 = vpop.f32.mrb[161].mxu0 }
 0x230   : > { %v2237_v14 = vadd.f32 %v5787_v8, %v2236_v10  ;;  %v4543_v3 = vpop.f32.mrb[162].mxu0  ;;  %4824 = vmatprep.subr.bf16.mxu1 %v4823_v7 }
 0x231   : > { %v2248_v11 = vadd.f32 %v5787_v8, %v4543_v3  ;;  %v2239_v24 = vpop.f32.mrb[163].mxu0  ;;  %4826 = vmatpush3.bf16.msra.mxu1 %v5966_v42  ;;  %v2781_v38 = vmax.f32 %v2245_v19, 0.0 }
 0x232   : > { %v2240_v25 = vadd.f32 %v5787_v8, %v2239_v24  ;;  %4828 = vmatprep.subr.bf16.mxu1 %v4827_v41  ;;  %v2779_v46 = vmax.f32 %v2237_v14, 0.0 }
 0x233   : > { %v2782_v58 = vmax.f32 %v2248_v11, 0.0 }
 0x234   : > { %v2780_v28 = vmax.f32 %v2240_v25, 0.0 }
 0x235   : > { %v6028_v34 = vpack.c.bf16 %v2782_v58, %v2781_v38  ;;  %4830 = vmatpush3.bf16.msra.mxu1 %v5964_v29 }
 0x236   : > { %v6034_v42 = vpack.c.bf16 %v2780_v28, %v2779_v46  ;;  %v4546_v53 = vpop.f32.mrb[164].mxu0 }
 0x237   : > { %v2261_v47 = vadd.f32 %v5787_v8, %v4546_v53  ;;  %v2252_v0 = vpop.f32.mrb[165].mxu0 }
 0x238   : > { %v2253_v15 = vadd.f32 %v5787_v8, %v2252_v0  ;;  %v4547_v18 = vpop.f32.mrb[166].mxu0  ;;  %3304 = vmatmul.mubr.f32.vlgmr.msra.gmra.mrb[68].mxu1 %v2914_v26 }
 0x239   : > { %v2264_v51 = vadd.f32 %v5787_v8, %v4547_v18  ;;  %v2255_v57 = vpop.f32.mrb[167].mxu0  ;;  %3373 = vmatprep.mubr.f32.mxu1 %v2926_v44  ;;  %v2785_v41 = vmax.f32 %v2261_v47, 0.0 }
 0x23a   : > { %v2256_v29 = vadd.f32 %v5787_v8, %v2255_v57  ;;  %v2783_v30 = vmax.f32 %v2253_v15, 0.0 }
 0x23b   : > { %v2786_v7 = vmax.f32 %v2264_v51, 0.0 }
 0x23c   : > { %v2784_v13 = vmax.f32 %v2256_v29, 0.0 }
 0x23d   : > { %v6040_v19 = vpack.c.bf16 %v2786_v7, %v2785_v41 }
 0x23e   : > { %v6042_v10 = vpack.c.bf16 %v2784_v13, %v2783_v30  ;;  %v4550_v14 = vpop.f32.mrb[168].mxu0 }
 0x23f   : > { %v2277_v3 = vadd.f32 %v5787_v8, %v4550_v14  ;;  %v2268_v11 = vpop.f32.mrb[169].mxu0 }
 0x240   : > { %v2269_v24 = vadd.f32 %v5787_v8, %v2268_v11  ;;  %v4551_v25 = vpop.f32.mrb[170].mxu0 }
 0x241   : > { %v2280_v38 = vadd.f32 %v5787_v8, %v4551_v25  ;;  %v2271_v58 = vpop.f32.mrb[171].mxu0  ;;  %v2789_v28 = vmax.f32 %v2277_v3, 0.0 }
 0x242   : > { %v2272_v46 = vadd.f32 %v5787_v8, %v2271_v58  ;;  %v2787_v44 = vmax.f32 %v2269_v24, 0.0 }
 0x243   : > { %v2790_v26 = vmax.f32 %v2280_v38, 0.0 }
 0x244   : > { %v2788_v53 = vmax.f32 %v2272_v46, 0.0 }
 0x245   : > { %v6048_v47 = vpack.c.bf16 %v2790_v26, %v2789_v28  ;;  %v6063_v26 = vld [vmem:[%s6243_s3] ss:$0 sm:$0xff] }
 0x246   : > { %v6050_v0 = vpack.c.bf16 %v2788_v53, %v2787_v44  ;;  %v4554_v15 = vpop.f32.mrb[172].mxu0 }
 0x247   : > { %v2293_v18 = vadd.f32 %v5787_v8, %v4554_v15  ;;  %v2284_v51 = vpop.f32.mrb[173].mxu0 }
 0x248   : > { %v2285_v57 = vadd.f32 %v5787_v8, %v2284_v51  ;;  %v4555_v29 = vpop.f32.mrb[174].mxu0 }
 0x249   : > { %v2296_v41 = vadd.f32 %v5787_v8, %v4555_v29  ;;  %v2287_v7 = vpop.f32.mrb[175].mxu0  ;;  %v2793_v13 = vmax.f32 %v2293_v18, 0.0 }
 0x24a   : > { %v2288_v30 = vadd.f32 %v5787_v8, %v2287_v7  ;;  %v2791_v11 = vmax.f32 %v2285_v57, 0.0 }
 0x24b   : > { %v2794_v14 = vmax.f32 %v2296_v41, 0.0  ;;  %v4144_v3 = vpop.f32.mrb[62].mxu1 }
 0x24c   : > { %v2792_v24 = vmax.f32 %v2288_v30, 0.0  ;;  %v4145_v25 = vpop.f32.mrb[63].mxu1 }
 0x24d   : > { %v6056_v38 = vpack.c.bf16 %v2794_v14, %v2793_v13  ;;  %v4146_v58 = vadd.f32 %v4145_v25, %v4144_v3 }
 0x24e   : > { %v6058_v46 = vpack.c.bf16 %v2792_v24, %v2791_v11  ;;  %v4558_v28 = vpop.f32.mrb[176].mxu0 }
 0x24f   : > { %v2309_v44 = vadd.f32 %v6063_v26, %v4558_v28  ;;  %v2300_v8 = vpop.f32.mrb[177].mxu0  ;;  %v6067_v53 = vadd.f32 %v4146_v58, %v6017_v63 }
 0x250   : > { %v2301_v15 = vadd.f32 %v6063_v26, %v2300_v8  ;;  %v4559_v18 = vpop.f32.mrb[178].mxu0 }
 0x251   : > { %v2312_v51 = vadd.f32 %v6063_v26, %v4559_v18  ;;  %v2303_v57 = vpop.f32.mrb[179].mxu0  ;;  %v2797_v41 = vmax.f32 %v2309_v44, 0.0 }
 0x252   : > { %v2304_v29 = vadd.f32 %v6063_v26, %v2303_v57  ;;  %v2795_v30 = vmax.f32 %v2301_v15, 0.0 }
 0x253   : > { %v2798_v7 = vmax.f32 %v2312_v51, 0.0 }
 0x254   : > { %v2796_v13 = vmax.f32 %v2304_v29, 0.0 }
 0x255   : > { %v4835_v14 = vpack.c.bf16 %v2798_v7, %v2797_v41 }
 0x256   : > { %v4831_v3 = vpack.c.bf16 %v2796_v13, %v2795_v30  ;;  %v4562_v11 = vpop.f32.mrb[180].mxu0 }
 0x257   : > { %v2325_v24 = vadd.f32 %v6063_v26, %v4562_v11  ;;  %v2316_v25 = vpop.f32.mrb[181].mxu0 }
 0x258   : > { %v2317_v63 = vadd.f32 %v6063_v26, %v2316_v25  ;;  %v4563_v58 = vpop.f32.mrb[182].mxu0  ;;  %4832 = vmatprep.subr.bf16.mxu1 %v4831_v3 }
 0x259   : > { %v2328_v28 = vadd.f32 %v6063_v26, %v4563_v58  ;;  %v2319_v8 = vpop.f32.mrb[183].mxu0  ;;  %4834 = vmatpush3.bf16.msra.mxu1 %v6034_v42  ;;  %v2801_v15 = vmax.f32 %v2325_v24, 0.0 }
 0x25a   : > { %v2320_v44 = vadd.f32 %v6063_v26, %v2319_v8  ;;  %4836 = vmatprep.subr.bf16.mxu1 %v4835_v14  ;;  %v2799_v51 = vmax.f32 %v2317_v63, 0.0 }
 0x25b   : > { %v2802_v18 = vmax.f32 %v2328_v28, 0.0 }
 0x25c   : > { %v2800_v57 = vmax.f32 %v2320_v44, 0.0 }
 0x25d   : > { %v4843_v29 = vpack.c.bf16 %v2802_v18, %v2801_v15  ;;  %4838 = vmatpush3.bf16.msra.mxu1 %v6028_v34 }
 0x25e   : > { %v4839_v41 = vpack.c.bf16 %v2800_v57, %v2799_v51  ;;  %v4566_v7 = vpop.f32.mrb[184].mxu0 }
 0x25f   : > { %v2341_v30 = vadd.f32 %v6063_v26, %v4566_v7  ;;  %v2332_v13 = vpop.f32.mrb[185].mxu0 }
 0x260   : > { %v2333_v3 = vadd.f32 %v6063_v26, %v2332_v13  ;;  %v4567_v11 = vpop.f32.mrb[186].mxu0  ;;  %4840 = vmatprep.subr.bf16.mxu1 %v4839_v41 }
 0x261   : > { %v2344_v42 = vadd.f32 %v6063_v26, %v4567_v11  ;;  %v2335_v25 = vpop.f32.mrb[187].mxu0  ;;  %4842 = vmatpush3.bf16.msra.mxu1 %v6042_v10  ;;  %v2805_v24 = vmax.f32 %v2341_v30, 0.0 }
 0x262   : > { %v2336_v14 = vadd.f32 %v6063_v26, %v2335_v25  ;;  %4844 = vmatprep.subr.bf16.mxu1 %v4843_v29  ;;  %v2803_v34 = vmax.f32 %v2333_v3, 0.0 }
 0x263   : > { %v2806_v63 = vmax.f32 %v2344_v42, 0.0 }
 0x264   : > { %v2804_v58 = vmax.f32 %v2336_v14, 0.0 }
 0x265   : > { %v4851_v28 = vpack.c.bf16 %v2806_v63, %v2805_v24  ;;  %4846 = vmatpush3.bf16.msra.mxu1 %v6040_v19 }
 0x266   : > { %v4847_v8 = vpack.c.bf16 %v2804_v58, %v2803_v34  ;;  %v4570_v44 = vpop.f32.mrb[188].mxu0 }
 0x267   : > { %v2357_v15 = vadd.f32 %v6063_v26, %v4570_v44  ;;  %v2348_v18 = vpop.f32.mrb[189].mxu0 }
 0x268   : > { %v2349_v51 = vadd.f32 %v6063_v26, %v2348_v18  ;;  %v4571_v57 = vpop.f32.mrb[190].mxu0  ;;  %4848 = vmatprep.subr.bf16.mxu1 %v4847_v8 }
 0x269   : > { %v2360_v10 = vadd.f32 %v6063_v26, %v4571_v57  ;;  %v2351_v41 = vpop.f32.mrb[191].mxu0  ;;  %4850 = vmatpush3.bf16.msra.mxu1 %v6050_v0  ;;  %v2809_v7 = vmax.f32 %v2357_v15, 0.0  ;;  %v2922_v15 = vrot.slane %v5898_v36, %v2889_v33 }
 0x26a   : > { %v2352_v29 = vadd.f32 %v6063_v26, %v2351_v41  ;;  %4852 = vmatprep.subr.bf16.mxu1 %v4851_v28  ;;  %v2807_v19 = vmax.f32 %v2349_v51, 0.0  ;;  %v2934_v51 = vrot.slane %v5898_v36, %v2901_v32 }
 0x26b   : > { %v2810_v30 = vmax.f32 %v2360_v10, 0.0 }
 0x26c   : > { %v2808_v13 = vmax.f32 %v2352_v29, 0.0 }
 0x26d   : > { %v4859_v3 = vpack.c.bf16 %v2810_v30, %v2809_v7  ;;  %4854 = vmatpush3.bf16.msra.mxu1 %v6048_v47  ;;  %v5201_v7 = vmov 0.0  }
 0x26e   : > { %v4855_v11 = vpack.c.bf16 %v2808_v13, %v2807_v19  ;;  %v4574_v42 = vpop.f32.mrb[192].mxu0 }
 0x26f   : > { %v2373_v25 = vadd.f32 %v6063_v26, %v4574_v42  ;;  %v2364_v14 = vpop.f32.mrb[193].mxu0 }
 0x270   : > { %v2365_v24 = vadd.f32 %v6063_v26, %v2364_v14  ;;  %v4575_v63 = vpop.f32.mrb[194].mxu0  ;;  %4856 = vmatprep.subr.bf16.mxu1 %v4855_v11 }
 0x271   : > { %v2813_v0 = vmax.f32 %v2373_v25, 0.0  ;;  %v2376_v34 = vadd.f32 %v6063_v26, %v4575_v63  ;;  %v2367_v58 = vpop.f32.mrb[195].mxu0  ;;  %4858 = vmatpush3.bf16.msra.mxu1 %v6058_v46  ;;  %v3533_v46 = vld [vmem:[%s6244_s4 + $0x70] sm:$0xff] }
 0x272   : > { %v2368_v28 = vadd.f32 %v6063_v26, %v2367_v58  ;;  %4860 = vmatprep.subr.bf16.mxu1 %v4859_v3  ;;  %v2811_v47 = vmax.f32 %v2365_v24, 0.0  ;;  %v3534_v26 = vld [vmem:[%s6244_s4 + $0x78] sm:$0xff]  ;;  %v3535_v58 = vld [vmem:[%s6245_s5] sm:$0x1] }
 0x273   : > { %v2814_v8 = vmax.f32 %v2376_v34, 0.0  ;;  %v4949_v10 = vpack.c.bf16 %v3534_v26, %v3533_v46 }
 0x274   : > { %v2812_v44 = vmax.f32 %v2368_v28, 0.0 }
 0x275   : > { %v4869_v18 = vpack.c.bf16 %v2814_v8, %v2813_v0  ;;  %4862 = vmatpush3.bf16.msra.mxu1 %v6056_v38 }
 0x276   : > { %v4865_v57 = vpack.c.bf16 %v2812_v44, %v2811_v47  ;;  %4864 = vmatprep.subr.bf16.mxu1 %v5842_v48 }
 0x278   : > { %3374 = vmatmul.mubr.f32.vlgmr.msra.gmra.mrb[70].mxu1 %v2922_v15 }
 0x279   : > { %4866 = vmatpush3.bf16.msra.mxu1 %v4865_v57  ;;  %3443 = vmatprep.mubr.f32.mxu1 %v2934_v51 }
 0x27a   : > { %4868 = vmatprep.subr.bf16.mxu1 %v5839_v43 }
 0x27d   : > { %4870 = vmatpush3.bf16.msra.mxu1 %v4869_v18 }
 0x27e   : > { %4872 = vmatprep.subr.bf16.mxu1 %v5855_v55  ;;  %v3519_v55 = vld [vmem:[%s6244_s4] sm:$0xff] }
 0x281   : > { %4874 = vmatpush3.bf16.msra.mxu1 %v5794_v1  ;;  %v6251_v1 = vsub.s32 7, %v5458_v20 }
 0x282   : > { %4876 = vmatprep.subr.bf16.mxu1 %v5852_v62 }
 0x285   : > { %4878 = vmatpush3.bf16.msra.mxu1 %v5791_v52  ;;  %v2930_v52 = vrot.slane %v5898_v36, %v2897_v56  ;;  %v6252_v56 = vsub.s32 6, %v5458_v20  ;;  %v3521_v20 = vld [vmem:[%s6244_s4 + $0x10] sm:$0xff] }
 0x286   : > { %4880 = vmatprep.subr.bf16.mxu1 %v5869_v9  ;;  %v5199_v9 = vmov 0.0|0.0  }
 0x289   : > { %4882 = vmatpush3.bf16.msra.mxu1 %v5810_v31  ;;  %v2942_v31 = vrot.slane %v5898_v36, %v6251_v1 }
 0x28a   : > { %4884 = vmatprep.subr.bf16.mxu1 %v5866_v4  ;;  %v3520_v4 = vld [vmem:[%s6244_s4 + $0x8] sm:$0xff] }
 0x28b   : > { %v4179_v33 = vpop.f32.mrb[64].mxu1 }
 0x28c   : > { %v4180_v32 = vpop.f32.mrb[65].mxu1 }
 0x28d   : > { %4886 = vmatpush3.bf16.msra.mxu1 %v5807_v50  ;;  %v4181_v43 = vadd.f32 %v4180_v32, %v4179_v33 }
 0x28e   : > { %4888 = vmatprep.subr.bf16.mxu1 %v5883_v12  ;;  %v3522_v12 = vld [vmem:[%s6244_s4 + $0x18] sm:$0xff] }
 0x28f   : > { %v3166_v48 = vadd.f32 %v4181_v43, %v6067_v53 }
 0x291   : > { %4890 = vmatpush3.bf16.msra.mxu1 %v5826_v6 }
 0x292   : > { %4892 = vmatprep.subr.bf16.mxu1 %v5880_v54  ;;  %v4928_v54 = vpack.c.bf16 %v3520_v4, %v3519_v55 }
 0x295   : > { %4894 = vmatpush3.bf16.msra.mxu1 %v5823_v35 }
 0x296   : > { %4896 = vmatprep.subr.bf16.mxu1 %v5973_v21  ;;  %v3529_v21 = vld [vmem:[%s6244_s4 + $0x50] sm:$0xff] }
 0x298   : > { %3444 = vmatmul.mubr.f32.vlgmr.msra.gmra.mrb[72].mxu1 %v2930_v52 }
 0x299   : > { %4898 = vmatpush3.bf16.msra.mxu1 %v5903_v40  ;;  %3513 = vmatprep.mubr.f32.mxu1 %v2942_v31  ;;  %v3524_v40 = vld [vmem:[%s6244_s4 + $0x28] sm:$0xff] }
 0x29a   : > { %4900 = vmatprep.subr.bf16.mxu1 %v5969_v60 }
 0x29d   : > { %4902 = vmatpush3.bf16.msra.mxu1 %v5900_v37  ;;  %v3523_v37 = vld [vmem:[%s6244_s4 + $0x20] sm:$0xff] }
 0x29e   : > { %4904 = vmatprep.subr.bf16.mxu1 %v5984_v5  ;;  %v3530_v5 = vld [vmem:[%s6244_s4 + $0x58] sm:$0xff] }
 0x2a1   : > { %4906 = vmatpush3.bf16.msra.mxu1 %v5927_v61  ;;  %v3525_v61 = vld [vmem:[%s6244_s4 + $0x30] sm:$0xff] }
 0x2a2   : > { %4908 = vmatprep.subr.bf16.mxu1 %v5981_v27  ;;  %v2938_v27 = vrot.slane %v5898_v36, %v6252_v56  ;;  %v4931_v36 = vpack.c.bf16 %v3522_v12, %v3521_v20 }
 0x2a5   : > { %4910 = vmatpush3.bf16.msra.mxu1 %v5923_v45  ;;  %v4934_v45 = vpack.c.bf16 %v3524_v40, %v3523_v37 }
 0x2a6   : > { %4912 = vmatprep.subr.bf16.mxu1 %v5999_v17  ;;  %v3531_v17 = vld [vmem:[%s6244_s4 + $0x60] sm:$0xff] }
 0x2a9   : > { %4914 = vmatpush3.bf16.msra.mxu1 %v5941_v49 }
 0x2aa   : > { %4916 = vmatprep.subr.bf16.mxu1 %v5995_v16  ;;  %v4943_v16 = vpack.c.bf16 %v3530_v5, %v3529_v21 }
 0x2ad   : > { %4918 = vmatpush3.bf16.msra.mxu1 %v5937_v39  ;;  %v3526_v39 = vld [vmem:[%s6244_s4 + $0x38] sm:$0xff] }
 0x2ae   : > { %4920 = vmatprep.subr.bf16.mxu1 %v6012_v22  ;;  %v4937_v49 = vpack.c.bf16 %v3526_v39, %v3525_v61 }
 0x2b1   : > { %4922 = vmatpush3.bf16.msra.mxu1 %v5957_v2  ;;  %v3528_v2 = vld [vmem:[%s6244_s4 + $0x48] sm:$0xff] }
 0x2b2   : > { %4924 = vmatprep.subr.bf16.mxu1 %v6009_v23  ;;  %v3532_v23 = vld [vmem:[%s6244_s4 + $0x68] sm:$0xff] }
 0x2b3   : > { %v4946_v22 = vpack.c.bf16 %v3532_v23, %v3531_v17 }
 0x2b5   : > { %4926 = vmatpush3.bf16.msra.mxu1 %v5953_v59  ;;  %v3527_v59 = vld [vmem:[%s6244_s4 + $0x40] sm:$0xff] }
 0x2b6   : > { %4927 = vmatprep.subr.bf16.mxu1 %v5199_v9  ;;  %v4940_v60 = vpack.c.bf16 %v3528_v2, %v3527_v59 }
 0x2b8   : > { %3514 = vmatmul.mubr.f32.vlgmr.msra.gmra.mrb[74].mxu1 %v2938_v27 }
 0x2b9   : > { %4929 = vmatpush3.bf16.msra.mxu1 %v4928_v54  ;;  %4668 = vmatprep.mubr.msk.f32.mxu1 %vm5200_vm2, %v5201_v7 }
 0x2ba   : > { %4930 = vmatprep.subr.bf16.mxu1 %v5199_v9 }
 0x2bd   : > { %4932 = vmatpush3.bf16.msra.mxu1 %v4931_v36 }
 0x2be   : > { %4933 = vmatprep.subr.bf16.mxu1 %v5199_v9 }
 0x2c1   : > { %4935 = vmatpush3.bf16.msra.mxu1 %v4934_v45 }
 0x2c2   : > { %4936 = vmatprep.subr.bf16.mxu1 %v5199_v9 }
 0x2c5   : > { %4938 = vmatpush3.bf16.msra.mxu1 %v4937_v49 }
 0x2c6   : > { %4939 = vmatprep.subr.bf16.mxu1 %v5199_v9 }
 0x2c9   : > { %4941 = vmatpush3.bf16.msra.mxu1 %v4940_v60 }
 0x2ca   : > { %4942 = vmatprep.subr.bf16.mxu1 %v5199_v9 }
 0x2cb   : > { %v4214_v50 = vpop.f32.mrb[66].mxu1 }
 0x2cc   : > { %v4215_v35 = vpop.f32.mrb[67].mxu1 }
 0x2cd   : > { %v4216_v6 = vadd.f32 %v4215_v35, %v4214_v50  ;;  %4944 = vmatpush3.bf16.msra.mxu1 %v4943_v16 }
 0x2ce   : > { %4945 = vmatprep.subr.bf16.mxu1 %v5199_v9 }
 0x2cf   : > { %v3236_v62 = vadd.f32 %v4216_v6, %v3166_v48 }
 0x2d1   : > { %4947 = vmatpush3.bf16.msra.mxu1 %v4946_v22 }
 0x2d2   : > { %4948 = vmatprep.subr.bf16.mxu1 %v5199_v9 }
 0x2d5   : > { %4950 = vmatpush3.bf16.msra.mxu1 %v4949_v10 }
 0x30b   : > { %v4249_v38 = vpop.f32.mrb[68].mxu1 }
 0x30c   : > { %v4250_v53 = vpop.f32.mrb[69].mxu1 }
 0x30d   : > { %v4251_v41 = vadd.f32 %v4250_v53, %v4249_v38 }
 0x30f   : > { %v3306_v29 = vadd.f32 %v4251_v41, %v3236_v62 }
 0x34b   : > { %v4284_v30 = vpop.f32.mrb[70].mxu1 }
 0x34c   : > { %v4285_v19 = vpop.f32.mrb[71].mxu1 }
 0x34d   : > { %v4286_v13 = vadd.f32 %v4285_v19, %v4284_v30 }
 0x34f   : > { %v3376_v3 = vadd.f32 %v4286_v13, %v3306_v29 }
 0x36b   : > { %v4319_v11 = vpop.f32.mrb[72].mxu1 }
 0x36c   : > { %v4320_v42 = vpop.f32.mrb[73].mxu1 }
 0x36d   : > { %v4321_v25 = vadd.f32 %v4320_v42, %v4319_v11 }
 0x36f   : > { %v3446_v14 = vadd.f32 %v4321_v25, %v3376_v3 }
 0x38b   : > { %v4354_v24 = vpop.f32.mrb[74].mxu1 }
 0x38c   : > { %v4355_v63 = vpop.f32.mrb[75].mxu1 }
 0x38d   : > { %v4356_v0 = vadd.f32 %v4355_v63, %v4354_v24 }
 0x38f   : > { %v3516_v34 = vadd.f32 %v4356_v0, %v3446_v14 }
 0x391   : > { %4669 = vmatmul.mubr.f32.vlgmr.msra.gmra.mrb[76].mxu1 %v3516_v34 }
 0x464   : > { %v3602_v28 = vpop.f32.mrb[76].mxu1 }
 0x465   : > { %v3603_v8 = vadd.f32 %v3602_v28, %v3535_v58  ;;  %v4670_v47 = vpop.f32.mrb[77].mxu1 }
 0x467   : > { %3607 = vst.msk [vmem:[%s243_s29] sm:$0x1] %vm3606_vm3, %v3603_v8 }
 0x468   : > { %5148 = shalt.err (!%p5145_p3)
}
 0x469   : > { %s5149_s17 = scalar_lea.hbm %s6198_s12, 16  ;;  %s5153_s20 = scalar_lea.hbm %s6246_s6, 32 }
 0x46a   : > { %p5150_p4 = scmp.ne.s32.totalorder %s6198_s12, %s5149_s17  ;;  %p5154_p9 = scmp.lt.u32.totalorder %s6198_s12, %s6246_s6 }
 0x46b   : > { %p5155_p10 = scmp.lt.u32.totalorder %s5153_s20, %s5149_s17  ;;  %p5157_p12 = scmp.lt.u32.totalorder %s5149_s17, %s6198_s12 }
 0x46c   : > { %p5151_p7 = pnand %p5150_p4, %p5276_p5 }
 0x46d   : > { %p5156_p11 = por %p5155_p10, %p5154_p9 }
 0x46e   : > { %p5152_p8 = pneg %p5151_p7 }
 0x46f   : > { %p5158_p13 = por %p5157_p12, %p5156_p11 }
 0x471   : > { %p5159_p0 = pnand %p5158_p13, %p5152_p8 }
 0x473   : > { %5162 = shalt.err (!%p5159_p0)
}
 0x474   : > { %4959 = dma.vmem_to_hbm [thread:$0]  (%p5276_p5), %s6200_s9, 16, %s6198_s12, %s3609_s13  }
 0x475 PF: > { %p4965_p1 = scmp.ge.s32.totalorder %s5197_s24, 2  ;;  %s3633_s29 = sand.u32 1, %s5185_s21  }
 0x476   : > { %s3634_s10 = scalar_lea.sflag [#allocation3], %s3633_s29 }
 0x477   : > { %p4962_p2 = pnand %p4965_p1, %p5280_p6 }
 0x479   : > { %5180 = dma.done.wait (!%p4962_p2), %s3634_s10, 16  }
 0x47a   : > { %5182 = vsyncadd (!%p4962_p2), %s3634_s10, 4294967280  ;;  %p16_p3 = scmp.ge.s32.totalorder %s5263_s27, 4   ;;  %s6253_s21 = smov %s5189_s22 }
 0x47b   : > { %s6254_s22 = smov %s5193_s23  ;;  %s6255_s23 = smov %s5274_s30 }
 0x47c   : > { %s6256_s24 = smov %s5263_s27  ;;  %18 = sbr.rel (!%p16_p3) target bundleno = 3 (0x3), region = 79 }
 0x483   :  { %3638 = vsyncpa [#allocation3], 1 }
 0x484   :  { %3640 = vsyncpa [#allocation3 + $0x1], 1 }

</bundles_post_ra>
